<compile_context>
chip_gen: v6e
topology: v6e:2x2x1
jax: 0.10.0
libtpu: 0.0.40
codegen_flags: <defaults>
</compile_context>

<pallas_src>
import functools

import jax
import jax.numpy as jnp
from jax.experimental import pallas as pl
from jax.experimental.pallas import tpu as pltpu


def _round_up(x, m):
    return ((x + m - 1) // m) * m


def _layer_norm(h, gamma, beta, true_dim, eps=1e-5):
    """LayerNorm over the last dim; correct even when h is lane-padded."""
    hp = h.shape[-1]
    if hp == true_dim:
        mean = jnp.mean(h, axis=-1, keepdims=True)
        var = jnp.mean((h - mean) ** 2, axis=-1, keepdims=True)
    else:
        mask = (jax.lax.broadcasted_iota(jnp.int32, h.shape, 1) < true_dim).astype(h.dtype)
        inv = 1.0 / float(true_dim)
        mean = jnp.sum(h * mask, axis=-1, keepdims=True) * inv
        cent = (h - mean) * mask
        var = jnp.sum(cent * cent, axis=-1, keepdims=True) * inv
    return (h - mean) * jax.lax.rsqrt(var + eps) * gamma + beta


def _forecast_kernel(
    x_ref,        # (TB, Dp)     f32  input features (batch tile)
    wfe1_ref,     # (Dp, Hp)     f32  feature_extractor Linear1 (in, out)
    bfe1_ref,     # (1, Hp)
    g1_ref,       # (1, Hp)           LayerNorm1 weight
    be1_ref,      # (1, Hp)           LayerNorm1 bias
    wfe2_ref,     # (Hp, Hp)          feature_extractor Linear2
    bfe2_ref,     # (1, Hp)
    g2_ref,       # (1, Hp)
    be2_ref,      # (1, Hp)
    wh1_ref,      # (NH, Hp, Hp)      forecast head Linear1 (stacked)
    bh1_ref,      # (NH, 1, Hp)
    wh2_ref,      # (NH, Hp, SQp)     forecast head Linear2 (stacked)
    bh2_ref,      # (NH, 1, SQp)
    wc1_ref,      # (Hp, Hp)          calibration Linear1
    bc1_ref,      # (1, Hp)
    wc2_ref,      # (Hp, NHp)         calibration Linear2
    bc2_ref,      # (1, NHp)
    ens_ref,      # (NH, TB, SQp) out ensemble forecasts (per head)
    calib_ref,    # (TB, SQp)     out calibrated forecast
    w_ref,        # (TB, NHp)     out calibration softmax weights
    *, hidden_dim, num_heads,
):
    f32 = jnp.float32
    x = x_ref[...]

    # --- feature extractor: (Linear -> LayerNorm -> ReLU -> Dropout[id]) x2 ---
    h = jnp.dot(x, wfe1_ref[...], preferred_element_type=f32) + bfe1_ref[...]
    h = _layer_norm(h, g1_ref[...], be1_ref[...], hidden_dim)
    h = jnp.maximum(h, 0.0)
    h = jnp.dot(h, wfe2_ref[...], preferred_element_type=f32) + bfe2_ref[...]
    h = _layer_norm(h, g2_ref[...], be2_ref[...], hidden_dim)
    feats = jnp.maximum(h, 0.0)                                   # (TB, Hp)

    # --- ensemble forecast heads (static unrolled loop over heads) ---
    fcs = []
    for k in range(num_heads):
        hh = jnp.dot(feats, wh1_ref[k], preferred_element_type=f32) + bh1_ref[k]
        hh = jnp.maximum(hh, 0.0)
        fc = jnp.dot(hh, wh2_ref[k], preferred_element_type=f32) + bh2_ref[k]  # (TB, SQp)
        ens_ref[k] = fc
        fcs.append(fc)

    # --- calibration network + softmax over heads (masked for lane padding) ---
    ch = jnp.dot(feats, wc1_ref[...], preferred_element_type=f32) + bc1_ref[...]
    ch = jnp.maximum(ch, 0.0)
    logits = jnp.dot(ch, wc2_ref[...], preferred_element_type=f32) + bc2_ref[...]  # (TB, NHp)
    if logits.shape[-1] > num_heads:
        lane = jax.lax.broadcasted_iota(jnp.int32, logits.shape, 1)
        logits = jnp.where(lane < num_heads, logits, -1e30)
    m = jnp.max(logits, axis=-1, keepdims=True)
    e = jnp.exp(logits - m)
    w = e / jnp.sum(e, axis=-1, keepdims=True)                    # (TB, NHp)
    w_ref[...] = w

    # --- calibrated forecast: sum_k w[:, k] * head_k ---
    calib = w[:, 0:1] * fcs[0]
    for k in range(1, num_heads):
        calib = calib + w[:, k:k + 1] * fcs[k]
    calib_ref[...] = calib


def uncertainty_aware_forecasting(x, params, *, hidden_dim, forecast_steps,
                                  num_quantiles, num_heads):
    """x: (B, input_dim) f32. Returns the same dict of outputs as the PyTorch module."""
    B, D = x.shape
    S, Q, NH = forecast_steps, num_quantiles, num_heads
    SQ = S * Q
    H = hidden_dim

    LANE, SUB = 128, 8
    Dp = _round_up(D, LANE)
    Hp = _round_up(H, LANE)
    SQp = _round_up(SQ, LANE)
    NHp = _round_up(max(NH, LANE), LANE)       # lane-dense calibration-weight output
    TB = min(128, _round_up(B, SUB))           # batch tile (multiple of 8 sublanes)
    Bp = _round_up(B, TB)

    def pad2(a, r, c):
        return jnp.pad(a, ((0, r - a.shape[0]), (0, c - a.shape[1])))

    def pad_row(a, c):  # (n,) -> (1, c)
        return jnp.pad(a.reshape(1, -1), ((0, 0), (0, c - a.shape[0])))

    def pad3(a, d0, r, c):
        return jnp.pad(a, ((0, d0 - a.shape[0]),
                           (0, r - a.shape[1]),
                           (0, c - a.shape[2])))

    x_p = pad2(x, Bp, Dp)
    args = (
        x_p,
        pad2(params["w_fe1"], Dp, Hp), pad_row(params["b_fe1"], Hp),
        pad_row(params["ln1_g"], Hp), pad_row(params["ln1_b"], Hp),
        pad2(params["w_fe2"], Hp, Hp), pad_row(params["b_fe2"], Hp),
        pad_row(params["ln2_g"], Hp), pad_row(params["ln2_b"], Hp),
        pad3(params["w_h1"], NH, Hp, Hp),
        pad3(params["b_h1"][:, None, :], NH, 1, Hp),
        pad3(params["w_h2"], NH, Hp, SQp),
        pad3(params["b_h2"][:, None, :], NH, 1, SQp),
        pad2(params["w_c1"], Hp, Hp), pad_row(params["b_c1"], Hp),
        pad2(params["w_c2"], Hp, NHp), pad_row(params["b_c2"], NHp),
    )

    # x block pipelines over the batch grid; every weight is VMEM-resident
    # (constant index_map) so it is DMA'd once, not per grid step.
    x_spec = pl.BlockSpec((TB, Dp), lambda b: (b, 0))
    weight_specs = [
        pl.BlockSpec(a.shape, (lambda b, nd=a.ndim: (0,) * nd)) for a in args[1:]
    ]

    out_shape = (
        jax.ShapeDtypeStruct((NH, Bp, SQp), jnp.float32),  # ensemble forecasts
        jax.ShapeDtypeStruct((Bp, SQp), jnp.float32),      # calibrated forecast
        jax.ShapeDtypeStruct((Bp, NHp), jnp.float32),      # calibration weights
    )
    out_specs = [
        pl.BlockSpec((NH, TB, SQp), lambda b: (0, b, 0)),
        pl.BlockSpec((TB, SQp), lambda b: (b, 0)),
        pl.BlockSpec((TB, NHp), lambda b: (b, 0)),
    ]

    kernel = functools.partial(_forecast_kernel, hidden_dim=H, num_heads=NH)

    ens_p, calib_p, w_p = pl.pallas_call(
        kernel,
        out_shape=out_shape,
        grid_spec=pltpu.PrefetchScalarGridSpec(
            num_scalar_prefetch=0,
            grid=(Bp // TB,),
            in_specs=[x_spec] + weight_specs,
            out_specs=out_specs,
        ),
        compiler_params=pltpu.CompilerParams(
            dimension_semantics=("parallel",)),  # batch axis -> v7x dual-TC split
    )(*args)

    # wrapper-side un-pad / reshape / cheap output slicing
    ens = jnp.transpose(ens_p[:, :B, :SQ], (1, 0, 2)).reshape(B, NH, S, Q)
    calibrated = calib_p[:B, :SQ].reshape(B, S, Q)
    weights = w_p[:B, :NH]
    median = calibrated[:, :, Q // 2]
    pi90 = jnp.stack([calibrated[:, :, 0], calibrated[:, :, Q - 1]], axis=-1)
    return {
        "median_forecast": median,
        "calibrated_forecast": calibrated,
        "prediction_interval_90": pi90,
        "ensemble_forecasts": ens,
        "calibration_weights": weights,
    }


def init_params(key, input_dim, hidden_dim, forecast_steps, num_quantiles, num_heads):
    D, H, SQ, NH = input_dim, hidden_dim, forecast_steps * num_quantiles, num_heads
    ks = jax.random.split(key, 12)
    s = 0.1
    return {
        # all Linear weights stored (in, out) so the kernel does x @ W directly
        "w_fe1": s * jax.random.normal(ks[0], (D, H), jnp.float32),
        "b_fe1": s * jax.random.normal(ks[1], (H,), jnp.float32),
        "ln1_g": jnp.ones((H,), jnp.float32),
        "ln1_b": jnp.zeros((H,), jnp.float32),
        "w_fe2": s * jax.random.normal(ks[2], (H, H), jnp.float32),
        "b_fe2": s * jax.random.normal(ks[3], (H,), jnp.float32),
        "ln2_g": jnp.ones((H,), jnp.float32),
        "ln2_b": jnp.zeros((H,), jnp.float32),
        "w_h1": s * jax.random.normal(ks[4], (NH, H, H), jnp.float32),
        "b_h1": s * jax.random.normal(ks[5], (NH, H), jnp.float32),
        "w_h2": s * jax.random.normal(ks[6], (NH, H, SQ), jnp.float32),
        "b_h2": s * jax.random.normal(ks[7], (NH, SQ), jnp.float32),
        "w_c1": s * jax.random.normal(ks[8], (H, H), jnp.float32),
        "b_c1": s * jax.random.normal(ks[9], (H,), jnp.float32),
        "w_c2": s * jax.random.normal(ks[10], (H, NH), jnp.float32),
        "b_c2": s * jax.random.normal(ks[11], (NH,), jnp.float32),
    }


def reference_jax(x, params, *, hidden_dim, forecast_steps, num_quantiles, num_heads):
    """Pure-JAX reference mirroring the PyTorch forward (eval mode)."""
    hi = jax.lax.Precision.HIGHEST
    B = x.shape[0]
    S, Q, NH = forecast_steps, num_quantiles, num_heads

    def ln(h, g, b, eps=1e-5):
        m = h.mean(-1, keepdims=True)
        v = ((h - m) ** 2).mean(-1, keepdims=True)
        return (h - m) * jax.lax.rsqrt(v + eps) * g + b

    h = jnp.dot(x, params["w_fe1"], precision=hi) + params["b_fe1"]
    h = jnp.maximum(ln(h, params["ln1_g"], params["ln1_b"]), 0.0)
    h = jnp.dot(h, params["w_fe2"], precision=hi) + params["b_fe2"]
    feats = jnp.maximum(ln(h, params["ln2_g"], params["ln2_b"]), 0.0)

    ens = []
    for k in range(NH):
        hh = jnp.maximum(jnp.dot(feats, params["w_h1"][k], precision=hi) + params["b_h1"][k], 0.0)
        ens.append(jnp.dot(hh, params["w_h2"][k], precision=hi) + params["b_h2"][k])
    ens = jnp.stack(ens, axis=1).reshape(B, NH, S, Q)

    ch = jnp.maximum(jnp.dot(feats, params["w_c1"], precision=hi) + params["b_c1"], 0.0)
    logits = jnp.dot(ch, params["w_c2"], precision=hi) + params["b_c2"]
    w = jax.nn.softmax(logits, axis=1)

    calibrated = (ens * w[:, :, None, None]).sum(axis=1)
    median = calibrated[:, :, Q // 2]
    pi90 = jnp.stack([calibrated[:, :, 0], calibrated[:, :, Q - 1]], axis=-1)
    return {
        "median_forecast": median,
        "calibrated_forecast": calibrated,
        "prediction_interval_90": pi90,
        "ensemble_forecasts": ens,
        "calibration_weights": w,
    }


if __name__ == "__main__":
    key = jax.random.PRNGKey(0)
    B, D, H = 8, 64, 128           # batch, input_dim, hidden_dim (lane-dense)
    S, Q, NH = 5, 9, 4             # forecast_steps, num_quantiles, num_heads

    kx, kp = jax.random.split(key)
    x = jax.random.normal(kx, (B, D), jnp.float32)
    params = init_params(kp, D, H, S, Q, NH)

    out = uncertainty_aware_forecasting(
        x, params, hidden_dim=H, forecast_steps=S, num_quantiles=Q, num_heads=NH)
    out = jax.block_until_ready(out)

    ref = reference_jax(
        x, params, hidden_dim=H, forecast_steps=S, num_quantiles=Q, num_heads=NH)

    assert out["median_forecast"].shape == (B, S)
    assert out["calibrated_forecast"].shape == (B, S, Q)
    assert out["prediction_interval_90"].shape == (B, S, 2)
    assert out["ensemble_forecasts"].shape == (B, NH, S, Q)
    assert out["calibration_weights"].shape == (B, NH)
    for name in ref:
        assert jnp.allclose(out[name], ref[name], atol=2e-3, rtol=2e-3), name

    print("KERNEL_OK")
</pallas_src>

<mosaic_0001>
module attributes {stable_mosaic.version = 11 : i64} {
  func.func @_forecast_kernel(%arg0: i32, %arg1: memref<8x128xf32, #tpu.memory_space<vmem>>, %arg2: memref<128x128xf32, #tpu.memory_space<vmem>>, %arg3: memref<1x128xf32, #tpu.memory_space<vmem>>, %arg4: memref<1x128xf32, #tpu.memory_space<vmem>>, %arg5: memref<1x128xf32, #tpu.memory_space<vmem>>, %arg6: memref<128x128xf32, #tpu.memory_space<vmem>>, %arg7: memref<1x128xf32, #tpu.memory_space<vmem>>, %arg8: memref<1x128xf32, #tpu.memory_space<vmem>>, %arg9: memref<1x128xf32, #tpu.memory_space<vmem>>, %arg10: memref<4x128x128xf32, #tpu.memory_space<vmem>>, %arg11: memref<4x1x128xf32, #tpu.memory_space<vmem>>, %arg12: memref<4x128x128xf32, #tpu.memory_space<vmem>>, %arg13: memref<4x1x128xf32, #tpu.memory_space<vmem>>, %arg14: memref<128x128xf32, #tpu.memory_space<vmem>>, %arg15: memref<1x128xf32, #tpu.memory_space<vmem>>, %arg16: memref<128x128xf32, #tpu.memory_space<vmem>>, %arg17: memref<1x128xf32, #tpu.memory_space<vmem>>, %arg18: memref<4x8x128xf32, #tpu.memory_space<vmem>>, %arg19: memref<8x128xf32, #tpu.memory_space<vmem>>, %arg20: memref<8x128xf32, #tpu.memory_space<vmem>>) attributes {dimension_semantics = [#tpu.dimension_semantics<parallel>], iteration_bounds = array<i64: 1>, scalar_prefetch = 0 : i64, scratch_operands = 0 : i64, tpu.core_type = #tpu.core_type<tc>, window_params = [{transform_indices = @transform_0, window_bounds = array<i64: 8, 128>}, {pipeline_mode = #tpu.pipeline_mode<synchronous>, transform_indices = @transform_1, window_bounds = array<i64: 128, 128>}, {pipeline_mode = #tpu.pipeline_mode<synchronous>, transform_indices = @transform_2, window_bounds = array<i64: 1, 128>}, {pipeline_mode = #tpu.pipeline_mode<synchronous>, transform_indices = @transform_3, window_bounds = array<i64: 1, 128>}, {pipeline_mode = #tpu.pipeline_mode<synchronous>, transform_indices = @transform_4, window_bounds = array<i64: 1, 128>}, {pipeline_mode = #tpu.pipeline_mode<synchronous>, transform_indices = @transform_5, window_bounds = array<i64: 128, 128>}, {pipeline_mode = #tpu.pipeline_mode<synchronous>, transform_indices = @transform_6, window_bounds = array<i64: 1, 128>}, {pipeline_mode = #tpu.pipeline_mode<synchronous>, transform_indices = @transform_7, window_bounds = array<i64: 1, 128>}, {pipeline_mode = #tpu.pipeline_mode<synchronous>, transform_indices = @transform_8, window_bounds = array<i64: 1, 128>}, {pipeline_mode = #tpu.pipeline_mode<synchronous>, transform_indices = @transform_9, window_bounds = array<i64: 4, 128, 128>}, {pipeline_mode = #tpu.pipeline_mode<synchronous>, transform_indices = @transform_10, window_bounds = array<i64: 4, 1, 128>}, {pipeline_mode = #tpu.pipeline_mode<synchronous>, transform_indices = @transform_11, window_bounds = array<i64: 4, 128, 128>}, {pipeline_mode = #tpu.pipeline_mode<synchronous>, transform_indices = @transform_12, window_bounds = array<i64: 4, 1, 128>}, {pipeline_mode = #tpu.pipeline_mode<synchronous>, transform_indices = @transform_13, window_bounds = array<i64: 128, 128>}, {pipeline_mode = #tpu.pipeline_mode<synchronous>, transform_indices = @transform_14, window_bounds = array<i64: 1, 128>}, {pipeline_mode = #tpu.pipeline_mode<synchronous>, transform_indices = @transform_15, window_bounds = array<i64: 128, 128>}, {pipeline_mode = #tpu.pipeline_mode<synchronous>, transform_indices = @transform_16, window_bounds = array<i64: 1, 128>}, {transform_indices = @transform_17, window_bounds = array<i64: 4, 8, 128>}, {transform_indices = @transform_18, window_bounds = array<i64: 8, 128>}, {transform_indices = @transform_19, window_bounds = array<i64: 8, 128>}]} {
    %c0 = arith.constant 0 : index
    %c0_0 = arith.constant 0 : index
    %0 = vector.load %arg1[%c0, %c0_0] : memref<8x128xf32, #tpu.memory_space<vmem>>, vector<8x128xf32>
    %c0_1 = arith.constant 0 : index
    %c0_2 = arith.constant 0 : index
    %1 = vector.load %arg2[%c0_1, %c0_2] : memref<128x128xf32, #tpu.memory_space<vmem>>, vector<128x128xf32>
    %cst = arith.constant dense<0.000000e+00> : vector<8x128xf32>
    %2 = tpu.matmul %0, %1, %cst {dimension_numbers = #tpu.dot_dimension_numbers<[1], [0], [0], [1], [0, 0, 1, 1], [], []>} : vector<8x128xf32>, vector<128x128xf32>, vector<8x128xf32> -> vector<8x128xf32>
    %c0_3 = arith.constant 0 : index
    %c0_4 = arith.constant 0 : index
    %3 = vector.load %arg3[%c0_3, %c0_4] : memref<1x128xf32, #tpu.memory_space<vmem>>, vector<1x128xf32>
    %4 = vector.broadcast %3 : vector<1x128xf32> to vector<8x128xf32>
    %5 = arith.addf %2, %4 : vector<8x128xf32>
    %c0_5 = arith.constant 0 : index
    %c0_6 = arith.constant 0 : index
    %6 = vector.load %arg4[%c0_5, %c0_6] : memref<1x128xf32, #tpu.memory_space<vmem>>, vector<1x128xf32>
    %c0_7 = arith.constant 0 : index
    %c0_8 = arith.constant 0 : index
    %7 = vector.load %arg5[%c0_7, %c0_8] : memref<1x128xf32, #tpu.memory_space<vmem>>, vector<1x128xf32>
    %cst_9 = arith.constant dense<0.000000e+00> : vector<8xf32>
    %8 = vector.multi_reduction <add>, %5, %cst_9 [1] : vector<8x128xf32> to vector<8xf32>
    %9 = vector.shape_cast %8 : vector<8xf32> to vector<8x1xf32>
    %cst_10 = arith.constant 1.280000e+02 : f32
    %10 = vector.broadcast %cst_10 : f32 to vector<8x1xf32>
    %11 = arith.divf %9, %10 : vector<8x1xf32>
    %12 = vector.broadcast %11 : vector<8x1xf32> to vector<8x128xf32>
    %13 = arith.subf %5, %12 : vector<8x128xf32>
    %14 = arith.mulf %13, %13 : vector<8x128xf32>
    %cst_11 = arith.constant dense<0.000000e+00> : vector<8xf32>
    %15 = vector.multi_reduction <add>, %14, %cst_11 [1] : vector<8x128xf32> to vector<8xf32>
    %16 = vector.shape_cast %15 : vector<8xf32> to vector<8x1xf32>
    %cst_12 = arith.constant 1.280000e+02 : f32
    %17 = vector.broadcast %cst_12 : f32 to vector<8x1xf32>
    %18 = arith.divf %16, %17 : vector<8x1xf32>
    %19 = vector.broadcast %11 : vector<8x1xf32> to vector<8x128xf32>
    %20 = arith.subf %5, %19 : vector<8x128xf32>
    %cst_13 = arith.constant 9.99999974E-6 : f32
    %21 = vector.broadcast %cst_13 : f32 to vector<8x1xf32>
    %22 = arith.addf %18, %21 : vector<8x1xf32>
    %23 = math.rsqrt %22 : vector<8x1xf32>
    %24 = vector.broadcast %23 : vector<8x1xf32> to vector<8x128xf32>
    %25 = arith.mulf %20, %24 : vector<8x128xf32>
    %26 = vector.broadcast %6 : vector<1x128xf32> to vector<8x128xf32>
    %27 = arith.mulf %25, %26 : vector<8x128xf32>
    %28 = vector.broadcast %7 : vector<1x128xf32> to vector<8x128xf32>
    %29 = arith.addf %27, %28 : vector<8x128xf32>
    %cst_14 = arith.constant 0.000000e+00 : f32
    %30 = vector.broadcast %cst_14 : f32 to vector<8x128xf32>
    %31 = arith.maximumf %29, %30 : vector<8x128xf32>
    %c0_15 = arith.constant 0 : index
    %c0_16 = arith.constant 0 : index
    %32 = vector.load %arg6[%c0_15, %c0_16] : memref<128x128xf32, #tpu.memory_space<vmem>>, vector<128x128xf32>
    %cst_17 = arith.constant dense<0.000000e+00> : vector<8x128xf32>
    %33 = tpu.matmul %31, %32, %cst_17 {dimension_numbers = #tpu.dot_dimension_numbers<[1], [0], [0], [1], [0, 0, 1, 1], [], []>} : vector<8x128xf32>, vector<128x128xf32>, vector<8x128xf32> -> vector<8x128xf32>
    %c0_18 = arith.constant 0 : index
    %c0_19 = arith.constant 0 : index
    %34 = vector.load %arg7[%c0_18, %c0_19] : memref<1x128xf32, #tpu.memory_space<vmem>>, vector<1x128xf32>
    %35 = vector.broadcast %34 : vector<1x128xf32> to vector<8x128xf32>
    %36 = arith.addf %33, %35 : vector<8x128xf32>
    %c0_20 = arith.constant 0 : index
    %c0_21 = arith.constant 0 : index
    %37 = vector.load %arg8[%c0_20, %c0_21] : memref<1x128xf32, #tpu.memory_space<vmem>>, vector<1x128xf32>
    %c0_22 = arith.constant 0 : index
    %c0_23 = arith.constant 0 : index
    %38 = vector.load %arg9[%c0_22, %c0_23] : memref<1x128xf32, #tpu.memory_space<vmem>>, vector<1x128xf32>
    %cst_24 = arith.constant dense<0.000000e+00> : vector<8xf32>
    %39 = vector.multi_reduction <add>, %36, %cst_24 [1] : vector<8x128xf32> to vector<8xf32>
    %40 = vector.shape_cast %39 : vector<8xf32> to vector<8x1xf32>
    %cst_25 = arith.constant 1.280000e+02 : f32
    %41 = vector.broadcast %cst_25 : f32 to vector<8x1xf32>
    %42 = arith.divf %40, %41 : vector<8x1xf32>
    %43 = vector.broadcast %42 : vector<8x1xf32> to vector<8x128xf32>
    %44 = arith.subf %36, %43 : vector<8x128xf32>
    %45 = arith.mulf %44, %44 : vector<8x128xf32>
    %cst_26 = arith.constant dense<0.000000e+00> : vector<8xf32>
    %46 = vector.multi_reduction <add>, %45, %cst_26 [1] : vector<8x128xf32> to vector<8xf32>
    %47 = vector.shape_cast %46 : vector<8xf32> to vector<8x1xf32>
    %cst_27 = arith.constant 1.280000e+02 : f32
    %48 = vector.broadcast %cst_27 : f32 to vector<8x1xf32>
    %49 = arith.divf %47, %48 : vector<8x1xf32>
    %50 = vector.broadcast %42 : vector<8x1xf32> to vector<8x128xf32>
    %51 = arith.subf %36, %50 : vector<8x128xf32>
    %cst_28 = arith.constant 9.99999974E-6 : f32
    %52 = vector.broadcast %cst_28 : f32 to vector<8x1xf32>
    %53 = arith.addf %49, %52 : vector<8x1xf32>
    %54 = math.rsqrt %53 : vector<8x1xf32>
    %55 = vector.broadcast %54 : vector<8x1xf32> to vector<8x128xf32>
    %56 = arith.mulf %51, %55 : vector<8x128xf32>
    %57 = vector.broadcast %37 : vector<1x128xf32> to vector<8x128xf32>
    %58 = arith.mulf %56, %57 : vector<8x128xf32>
    %59 = vector.broadcast %38 : vector<1x128xf32> to vector<8x128xf32>
    %60 = arith.addf %58, %59 : vector<8x128xf32>
    %cst_29 = arith.constant 0.000000e+00 : f32
    %61 = vector.broadcast %cst_29 : f32 to vector<8x128xf32>
    %62 = arith.maximumf %60, %61 : vector<8x128xf32>
    %c0_30 = arith.constant 0 : index
    %c0_31 = arith.constant 0 : index
    %c0_32 = arith.constant 0 : index
    %63 = vector.load %arg10[%c0_30, %c0_31, %c0_32] : memref<4x128x128xf32, #tpu.memory_space<vmem>>, vector<1x128x128xf32>
    %64 = vector.shape_cast %63 : vector<1x128x128xf32> to vector<128x128xf32>
    %cst_33 = arith.constant dense<0.000000e+00> : vector<8x128xf32>
    %65 = tpu.matmul %62, %64, %cst_33 {dimension_numbers = #tpu.dot_dimension_numbers<[1], [0], [0], [1], [0, 0, 1, 1], [], []>} : vector<8x128xf32>, vector<128x128xf32>, vector<8x128xf32> -> vector<8x128xf32>
    %c0_34 = arith.constant 0 : index
    %c0_35 = arith.constant 0 : index
    %c0_36 = arith.constant 0 : index
    %66 = vector.load %arg11[%c0_34, %c0_35, %c0_36] : memref<4x1x128xf32, #tpu.memory_space<vmem>>, vector<1x1x128xf32>
    %67 = vector.shape_cast %66 : vector<1x1x128xf32> to vector<1x128xf32>
    %68 = vector.broadcast %67 : vector<1x128xf32> to vector<8x128xf32>
    %69 = arith.addf %65, %68 : vector<8x128xf32>
    %cst_37 = arith.constant 0.000000e+00 : f32
    %70 = vector.broadcast %cst_37 : f32 to vector<8x128xf32>
    %71 = arith.maximumf %69, %70 : vector<8x128xf32>
    %c0_38 = arith.constant 0 : index
    %c0_39 = arith.constant 0 : index
    %c0_40 = arith.constant 0 : index
    %72 = vector.load %arg12[%c0_38, %c0_39, %c0_40] : memref<4x128x128xf32, #tpu.memory_space<vmem>>, vector<1x128x128xf32>
    %73 = vector.shape_cast %72 : vector<1x128x128xf32> to vector<128x128xf32>
    %cst_41 = arith.constant dense<0.000000e+00> : vector<8x128xf32>
    %74 = tpu.matmul %71, %73, %cst_41 {dimension_numbers = #tpu.dot_dimension_numbers<[1], [0], [0], [1], [0, 0, 1, 1], [], []>} : vector<8x128xf32>, vector<128x128xf32>, vector<8x128xf32> -> vector<8x128xf32>
    %c0_42 = arith.constant 0 : index
    %c0_43 = arith.constant 0 : index
    %c0_44 = arith.constant 0 : index
    %75 = vector.load %arg13[%c0_42, %c0_43, %c0_44] : memref<4x1x128xf32, #tpu.memory_space<vmem>>, vector<1x1x128xf32>
    %76 = vector.shape_cast %75 : vector<1x1x128xf32> to vector<1x128xf32>
    %77 = vector.broadcast %76 : vector<1x128xf32> to vector<8x128xf32>
    %78 = arith.addf %74, %77 : vector<8x128xf32>
    %c0_45 = arith.constant 0 : index
    %c0_46 = arith.constant 0 : index
    %c0_47 = arith.constant 0 : index
    %79 = vector.load %arg18[%c0_45, %c0_46, %c0_47] : memref<4x8x128xf32, #tpu.memory_space<vmem>>, vector<1x8x128xf32>
    %80 = vector.shape_cast %79 : vector<1x8x128xf32> to vector<8x128xf32>
    %81 = vector.shape_cast %78 : vector<8x128xf32> to vector<1x8x128xf32>
    tpu.vector_store %arg18[%c0_45, %c0_46, %c0_47], %81 {strides = array<i32>} : memref<4x8x128xf32, #tpu.memory_space<vmem>>, vector<1x8x128xf32>,
    %c1 = arith.constant 1 : index
    %c0_48 = arith.constant 0 : index
    %c0_49 = arith.constant 0 : index
    %82 = vector.load %arg10[%c1, %c0_48, %c0_49] : memref<4x128x128xf32, #tpu.memory_space<vmem>>, vector<1x128x128xf32>
    %83 = vector.shape_cast %82 : vector<1x128x128xf32> to vector<128x128xf32>
    %cst_50 = arith.constant dense<0.000000e+00> : vector<8x128xf32>
    %84 = tpu.matmul %62, %83, %cst_50 {dimension_numbers = #tpu.dot_dimension_numbers<[1], [0], [0], [1], [0, 0, 1, 1], [], []>} : vector<8x128xf32>, vector<128x128xf32>, vector<8x128xf32> -> vector<8x128xf32>
    %c1_51 = arith.constant 1 : index
    %c0_52 = arith.constant 0 : index
    %c0_53 = arith.constant 0 : index
    %85 = vector.load %arg11[%c1_51, %c0_52, %c0_53] : memref<4x1x128xf32, #tpu.memory_space<vmem>>, vector<1x1x128xf32>
    %86 = vector.shape_cast %85 : vector<1x1x128xf32> to vector<1x128xf32>
    %87 = vector.broadcast %86 : vector<1x128xf32> to vector<8x128xf32>
    %88 = arith.addf %84, %87 : vector<8x128xf32>
    %cst_54 = arith.constant 0.000000e+00 : f32
    %89 = vector.broadcast %cst_54 : f32 to vector<8x128xf32>
    %90 = arith.maximumf %88, %89 : vector<8x128xf32>
    %c1_55 = arith.constant 1 : index
    %c0_56 = arith.constant 0 : index
    %c0_57 = arith.constant 0 : index
    %91 = vector.load %arg12[%c1_55, %c0_56, %c0_57] : memref<4x128x128xf32, #tpu.memory_space<vmem>>, vector<1x128x128xf32>
    %92 = vector.shape_cast %91 : vector<1x128x128xf32> to vector<128x128xf32>
    %cst_58 = arith.constant dense<0.000000e+00> : vector<8x128xf32>
    %93 = tpu.matmul %90, %92, %cst_58 {dimension_numbers = #tpu.dot_dimension_numbers<[1], [0], [0], [1], [0, 0, 1, 1], [], []>} : vector<8x128xf32>, vector<128x128xf32>, vector<8x128xf32> -> vector<8x128xf32>
    %c1_59 = arith.constant 1 : index
    %c0_60 = arith.constant 0 : index
    %c0_61 = arith.constant 0 : index
    %94 = vector.load %arg13[%c1_59, %c0_60, %c0_61] : memref<4x1x128xf32, #tpu.memory_space<vmem>>, vector<1x1x128xf32>
    %95 = vector.shape_cast %94 : vector<1x1x128xf32> to vector<1x128xf32>
    %96 = vector.broadcast %95 : vector<1x128xf32> to vector<8x128xf32>
    %97 = arith.addf %93, %96 : vector<8x128xf32>
    %c1_62 = arith.constant 1 : index
    %c0_63 = arith.constant 0 : index
    %c0_64 = arith.constant 0 : index
    %98 = vector.load %arg18[%c1_62, %c0_63, %c0_64] : memref<4x8x128xf32, #tpu.memory_space<vmem>>, vector<1x8x128xf32>
    %99 = vector.shape_cast %98 : vector<1x8x128xf32> to vector<8x128xf32>
    %100 = vector.shape_cast %97 : vector<8x128xf32> to vector<1x8x128xf32>
    tpu.vector_store %arg18[%c1_62, %c0_63, %c0_64], %100 {strides = array<i32>} : memref<4x8x128xf32, #tpu.memory_space<vmem>>, vector<1x8x128xf32>,
    %c2 = arith.constant 2 : index
    %c0_65 = arith.constant 0 : index
    %c0_66 = arith.constant 0 : index
    %101 = vector.load %arg10[%c2, %c0_65, %c0_66] : memref<4x128x128xf32, #tpu.memory_space<vmem>>, vector<1x128x128xf32>
    %102 = vector.shape_cast %101 : vector<1x128x128xf32> to vector<128x128xf32>
    %cst_67 = arith.constant dense<0.000000e+00> : vector<8x128xf32>
    %103 = tpu.matmul %62, %102, %cst_67 {dimension_numbers = #tpu.dot_dimension_numbers<[1], [0], [0], [1], [0, 0, 1, 1], [], []>} : vector<8x128xf32>, vector<128x128xf32>, vector<8x128xf32> -> vector<8x128xf32>
    %c2_68 = arith.constant 2 : index
    %c0_69 = arith.constant 0 : index
    %c0_70 = arith.constant 0 : index
    %104 = vector.load %arg11[%c2_68, %c0_69, %c0_70] : memref<4x1x128xf32, #tpu.memory_space<vmem>>, vector<1x1x128xf32>
    %105 = vector.shape_cast %104 : vector<1x1x128xf32> to vector<1x128xf32>
    %106 = vector.broadcast %105 : vector<1x128xf32> to vector<8x128xf32>
    %107 = arith.addf %103, %106 : vector<8x128xf32>
    %cst_71 = arith.constant 0.000000e+00 : f32
    %108 = vector.broadcast %cst_71 : f32 to vector<8x128xf32>
    %109 = arith.maximumf %107, %108 : vector<8x128xf32>
    %c2_72 = arith.constant 2 : index
    %c0_73 = arith.constant 0 : index
    %c0_74 = arith.constant 0 : index
    %110 = vector.load %arg12[%c2_72, %c0_73, %c0_74] : memref<4x128x128xf32, #tpu.memory_space<vmem>>, vector<1x128x128xf32>
    %111 = vector.shape_cast %110 : vector<1x128x128xf32> to vector<128x128xf32>
    %cst_75 = arith.constant dense<0.000000e+00> : vector<8x128xf32>
    %112 = tpu.matmul %109, %111, %cst_75 {dimension_numbers = #tpu.dot_dimension_numbers<[1], [0], [0], [1], [0, 0, 1, 1], [], []>} : vector<8x128xf32>, vector<128x128xf32>, vector<8x128xf32> -> vector<8x128xf32>
    %c2_76 = arith.constant 2 : index
    %c0_77 = arith.constant 0 : index
    %c0_78 = arith.constant 0 : index
    %113 = vector.load %arg13[%c2_76, %c0_77, %c0_78] : memref<4x1x128xf32, #tpu.memory_space<vmem>>, vector<1x1x128xf32>
    %114 = vector.shape_cast %113 : vector<1x1x128xf32> to vector<1x128xf32>
    %115 = vector.broadcast %114 : vector<1x128xf32> to vector<8x128xf32>
    %116 = arith.addf %112, %115 : vector<8x128xf32>
    %c2_79 = arith.constant 2 : index
    %c0_80 = arith.constant 0 : index
    %c0_81 = arith.constant 0 : index
    %117 = vector.load %arg18[%c2_79, %c0_80, %c0_81] : memref<4x8x128xf32, #tpu.memory_space<vmem>>, vector<1x8x128xf32>
    %118 = vector.shape_cast %117 : vector<1x8x128xf32> to vector<8x128xf32>
    %119 = vector.shape_cast %116 : vector<8x128xf32> to vector<1x8x128xf32>
    tpu.vector_store %arg18[%c2_79, %c0_80, %c0_81], %119 {strides = array<i32>} : memref<4x8x128xf32, #tpu.memory_space<vmem>>, vector<1x8x128xf32>,
    %c3 = arith.constant 3 : index
    %c0_82 = arith.constant 0 : index
    %c0_83 = arith.constant 0 : index
    %120 = vector.load %arg10[%c3, %c0_82, %c0_83] : memref<4x128x128xf32, #tpu.memory_space<vmem>>, vector<1x128x128xf32>
    %121 = vector.shape_cast %120 : vector<1x128x128xf32> to vector<128x128xf32>
    %cst_84 = arith.constant dense<0.000000e+00> : vector<8x128xf32>
    %122 = tpu.matmul %62, %121, %cst_84 {dimension_numbers = #tpu.dot_dimension_numbers<[1], [0], [0], [1], [0, 0, 1, 1], [], []>} : vector<8x128xf32>, vector<128x128xf32>, vector<8x128xf32> -> vector<8x128xf32>
    %c3_85 = arith.constant 3 : index
    %c0_86 = arith.constant 0 : index
    %c0_87 = arith.constant 0 : index
    %123 = vector.load %arg11[%c3_85, %c0_86, %c0_87] : memref<4x1x128xf32, #tpu.memory_space<vmem>>, vector<1x1x128xf32>
    %124 = vector.shape_cast %123 : vector<1x1x128xf32> to vector<1x128xf32>
    %125 = vector.broadcast %124 : vector<1x128xf32> to vector<8x128xf32>
    %126 = arith.addf %122, %125 : vector<8x128xf32>
    %cst_88 = arith.constant 0.000000e+00 : f32
    %127 = vector.broadcast %cst_88 : f32 to vector<8x128xf32>
    %128 = arith.maximumf %126, %127 : vector<8x128xf32>
    %c3_89 = arith.constant 3 : index
    %c0_90 = arith.constant 0 : index
    %c0_91 = arith.constant 0 : index
    %129 = vector.load %arg12[%c3_89, %c0_90, %c0_91] : memref<4x128x128xf32, #tpu.memory_space<vmem>>, vector<1x128x128xf32>
    %130 = vector.shape_cast %129 : vector<1x128x128xf32> to vector<128x128xf32>
    %cst_92 = arith.constant dense<0.000000e+00> : vector<8x128xf32>
    %131 = tpu.matmul %128, %130, %cst_92 {dimension_numbers = #tpu.dot_dimension_numbers<[1], [0], [0], [1], [0, 0, 1, 1], [], []>} : vector<8x128xf32>, vector<128x128xf32>, vector<8x128xf32> -> vector<8x128xf32>
    %c3_93 = arith.constant 3 : index
    %c0_94 = arith.constant 0 : index
    %c0_95 = arith.constant 0 : index
    %132 = vector.load %arg13[%c3_93, %c0_94, %c0_95] : memref<4x1x128xf32, #tpu.memory_space<vmem>>, vector<1x1x128xf32>
    %133 = vector.shape_cast %132 : vector<1x1x128xf32> to vector<1x128xf32>
    %134 = vector.broadcast %133 : vector<1x128xf32> to vector<8x128xf32>
    %135 = arith.addf %131, %134 : vector<8x128xf32>
    %c3_96 = arith.constant 3 : index
    %c0_97 = arith.constant 0 : index
    %c0_98 = arith.constant 0 : index
    %136 = vector.load %arg18[%c3_96, %c0_97, %c0_98] : memref<4x8x128xf32, #tpu.memory_space<vmem>>, vector<1x8x128xf32>
    %137 = vector.shape_cast %136 : vector<1x8x128xf32> to vector<8x128xf32>
    %138 = vector.shape_cast %135 : vector<8x128xf32> to vector<1x8x128xf32>
    tpu.vector_store %arg18[%c3_96, %c0_97, %c0_98], %138 {strides = array<i32>} : memref<4x8x128xf32, #tpu.memory_space<vmem>>, vector<1x8x128xf32>,
    %c0_99 = arith.constant 0 : index
    %c0_100 = arith.constant 0 : index
    %139 = vector.load %arg14[%c0_99, %c0_100] : memref<128x128xf32, #tpu.memory_space<vmem>>, vector<128x128xf32>
    %cst_101 = arith.constant dense<0.000000e+00> : vector<8x128xf32>
    %140 = tpu.matmul %62, %139, %cst_101 {dimension_numbers = #tpu.dot_dimension_numbers<[1], [0], [0], [1], [0, 0, 1, 1], [], []>} : vector<8x128xf32>, vector<128x128xf32>, vector<8x128xf32> -> vector<8x128xf32>
    %c0_102 = arith.constant 0 : index
    %c0_103 = arith.constant 0 : index
    %141 = vector.load %arg15[%c0_102, %c0_103] : memref<1x128xf32, #tpu.memory_space<vmem>>, vector<1x128xf32>
    %142 = vector.broadcast %141 : vector<1x128xf32> to vector<8x128xf32>
    %143 = arith.addf %140, %142 : vector<8x128xf32>
    %cst_104 = arith.constant 0.000000e+00 : f32
    %144 = vector.broadcast %cst_104 : f32 to vector<8x128xf32>
    %145 = arith.maximumf %143, %144 : vector<8x128xf32>
    %c0_105 = arith.constant 0 : index
    %c0_106 = arith.constant 0 : index
    %146 = vector.load %arg16[%c0_105, %c0_106] : memref<128x128xf32, #tpu.memory_space<vmem>>, vector<128x128xf32>
    %cst_107 = arith.constant dense<0.000000e+00> : vector<8x128xf32>
    %147 = tpu.matmul %145, %146, %cst_107 {dimension_numbers = #tpu.dot_dimension_numbers<[1], [0], [0], [1], [0, 0, 1, 1], [], []>} : vector<8x128xf32>, vector<128x128xf32>, vector<8x128xf32> -> vector<8x128xf32>
    %c0_108 = arith.constant 0 : index
    %c0_109 = arith.constant 0 : index
    %148 = vector.load %arg17[%c0_108, %c0_109] : memref<1x128xf32, #tpu.memory_space<vmem>>, vector<1x128xf32>
    %149 = vector.broadcast %148 : vector<1x128xf32> to vector<8x128xf32>
    %150 = arith.addf %147, %149 : vector<8x128xf32>
    %151 = tpu.iota {dimensions = array<i32: 1>} : vector<8x128xi32>
    %c4_i32 = arith.constant 4 : i32
    %152 = vector.broadcast %c4_i32 : i32 to vector<8x128xi32>
    %153 = arith.cmpi slt, %151, %152 : vector<8x128xi32>
    %cst_110 = arith.constant -1.000000e+30 : f32
    %154 = vector.broadcast %cst_110 : f32 to vector<8x128xf32>
    %155 = arith.select %153, %150, %154 : vector<8x128xi1>, vector<8x128xf32>
    %cst_111 = arith.constant dense<0xFF800000> : vector<8xf32>
    %156 = vector.multi_reduction <maximumf>, %155, %cst_111 [1] : vector<8x128xf32> to vector<8xf32>
    %157 = vector.shape_cast %156 : vector<8xf32> to vector<8x1xf32>
    %158 = vector.broadcast %157 : vector<8x1xf32> to vector<8x128xf32>
    %159 = arith.subf %155, %158 : vector<8x128xf32>
    %160 = math.exp %159 : vector<8x128xf32>
    %cst_112 = arith.constant dense<0.000000e+00> : vector<8xf32>
    %161 = vector.multi_reduction <add>, %160, %cst_112 [1] : vector<8x128xf32> to vector<8xf32>
    %162 = vector.shape_cast %161 : vector<8xf32> to vector<8x1xf32>
    %163 = vector.broadcast %162 : vector<8x1xf32> to vector<8x128xf32>
    %164 = arith.divf %160, %163 : vector<8x128xf32>
    %c0_113 = arith.constant 0 : index
    %c0_114 = arith.constant 0 : index
    %165 = vector.load %arg20[%c0_113, %c0_114] : memref<8x128xf32, #tpu.memory_space<vmem>>, vector<8x128xf32>
    tpu.vector_store %arg20[%c0_113, %c0_114], %164 {strides = array<i32>} : memref<8x128xf32, #tpu.memory_space<vmem>>, vector<8x128xf32>,
    %166 = vector.extract_strided_slice %164 {offsets = [0, 0], sizes = [8, 1], strides = [1, 1]} : vector<8x128xf32> to vector<8x1xf32>
    %167 = vector.broadcast %166 : vector<8x1xf32> to vector<8x128xf32>
    %168 = arith.mulf %167, %78 : vector<8x128xf32>
    %169 = vector.extract_strided_slice %164 {offsets = [0, 1], sizes = [8, 1], strides = [1, 1]} : vector<8x128xf32> to vector<8x1xf32>
    %170 = vector.broadcast %169 : vector<8x1xf32> to vector<8x128xf32>
    %171 = arith.mulf %170, %97 : vector<8x128xf32>
    %172 = arith.addf %168, %171 : vector<8x128xf32>
    %173 = vector.extract_strided_slice %164 {offsets = [0, 2], sizes = [8, 1], strides = [1, 1]} : vector<8x128xf32> to vector<8x1xf32>
    %174 = vector.broadcast %173 : vector<8x1xf32> to vector<8x128xf32>
    %175 = arith.mulf %174, %116 : vector<8x128xf32>
    %176 = arith.addf %172, %175 : vector<8x128xf32>
    %177 = vector.extract_strided_slice %164 {offsets = [0, 3], sizes = [8, 1], strides = [1, 1]} : vector<8x128xf32> to vector<8x1xf32>
    %178 = vector.broadcast %177 : vector<8x1xf32> to vector<8x128xf32>
    %179 = arith.mulf %178, %135 : vector<8x128xf32>
    %180 = arith.addf %176, %179 : vector<8x128xf32>
    %c0_115 = arith.constant 0 : index
    %c0_116 = arith.constant 0 : index
    %181 = vector.load %arg19[%c0_115, %c0_116] : memref<8x128xf32, #tpu.memory_space<vmem>>, vector<8x128xf32>
    tpu.vector_store %arg19[%c0_115, %c0_116], %180 {strides = array<i32>} : memref<8x128xf32, #tpu.memory_space<vmem>>, vector<8x128xf32>,
    return
  }
  func.func @transform_0(%arg0: i32) -> (i32, i32) {
    %c0_i32 = arith.constant 0 : i32
    %c0_i32_0 = arith.constant 0 : i32
    return %arg0, %c0_i32 : i32, i32
  }
  func.func @transform_1(%arg0: i32) -> (i32, i32) {
    %c0_i32 = arith.constant 0 : i32
    %c0_i32_0 = arith.constant 0 : i32
    %c0_i32_1 = arith.constant 0 : i32
    return %c0_i32, %c0_i32_0 : i32, i32
  }
  func.func @transform_2(%arg0: i32) -> (i32, i32) {
    %c0_i32 = arith.constant 0 : i32
    %c0_i32_0 = arith.constant 0 : i32
    %c0_i32_1 = arith.constant 0 : i32
    return %c0_i32, %c0_i32_0 : i32, i32
  }
  func.func @transform_3(%arg0: i32) -> (i32, i32) {
    %c0_i32 = arith.constant 0 : i32
    %c0_i32_0 = arith.constant 0 : i32
    %c0_i32_1 = arith.constant 0 : i32
    return %c0_i32, %c0_i32_0 : i32, i32
  }
  func.func @transform_4(%arg0: i32) -> (i32, i32) {
    %c0_i32 = arith.constant 0 : i32
    %c0_i32_0 = arith.constant 0 : i32
    %c0_i32_1 = arith.constant 0 : i32
    return %c0_i32, %c0_i32_0 : i32, i32
  }
  func.func @transform_5(%arg0: i32) -> (i32, i32) {
    %c0_i32 = arith.constant 0 : i32
    %c0_i32_0 = arith.constant 0 : i32
    %c0_i32_1 = arith.constant 0 : i32
    return %c0_i32, %c0_i32_0 : i32, i32
  }
  func.func @transform_6(%arg0: i32) -> (i32, i32) {
    %c0_i32 = arith.constant 0 : i32
    %c0_i32_0 = arith.constant 0 : i32
    %c0_i32_1 = arith.constant 0 : i32
    return %c0_i32, %c0_i32_0 : i32, i32
  }
  func.func @transform_7(%arg0: i32) -> (i32, i32) {
    %c0_i32 = arith.constant 0 : i32
    %c0_i32_0 = arith.constant 0 : i32
    %c0_i32_1 = arith.constant 0 : i32
    return %c0_i32, %c0_i32_0 : i32, i32
  }
  func.func @transform_8(%arg0: i32) -> (i32, i32) {
    %c0_i32 = arith.constant 0 : i32
    %c0_i32_0 = arith.constant 0 : i32
    %c0_i32_1 = arith.constant 0 : i32
    return %c0_i32, %c0_i32_0 : i32, i32
  }
  func.func @transform_9(%arg0: i32) -> (i32, i32, i32) {
    %c0_i32 = arith.constant 0 : i32
    %c0_i32_0 = arith.constant 0 : i32
    %c0_i32_1 = arith.constant 0 : i32
    %c0_i32_2 = arith.constant 0 : i32
    return %c0_i32, %c0_i32_0, %c0_i32_1 : i32, i32, i32
  }
  func.func @transform_10(%arg0: i32) -> (i32, i32, i32) {
    %c0_i32 = arith.constant 0 : i32
    %c0_i32_0 = arith.constant 0 : i32
    %c0_i32_1 = arith.constant 0 : i32
    %c0_i32_2 = arith.constant 0 : i32
    return %c0_i32, %c0_i32_0, %c0_i32_1 : i32, i32, i32
  }
  func.func @transform_11(%arg0: i32) -> (i32, i32, i32) {
    %c0_i32 = arith.constant 0 : i32
    %c0_i32_0 = arith.constant 0 : i32
    %c0_i32_1 = arith.constant 0 : i32
    %c0_i32_2 = arith.constant 0 : i32
    return %c0_i32, %c0_i32_0, %c0_i32_1 : i32, i32, i32
  }
  func.func @transform_12(%arg0: i32) -> (i32, i32, i32) {
    %c0_i32 = arith.constant 0 : i32
    %c0_i32_0 = arith.constant 0 : i32
    %c0_i32_1 = arith.constant 0 : i32
    %c0_i32_2 = arith.constant 0 : i32
    return %c0_i32, %c0_i32_0, %c0_i32_1 : i32, i32, i32
  }
  func.func @transform_13(%arg0: i32) -> (i32, i32) {
    %c0_i32 = arith.constant 0 : i32
    %c0_i32_0 = arith.constant 0 : i32
    %c0_i32_1 = arith.constant 0 : i32
    return %c0_i32, %c0_i32_0 : i32, i32
  }
  func.func @transform_14(%arg0: i32) -> (i32, i32) {
    %c0_i32 = arith.constant 0 : i32
    %c0_i32_0 = arith.constant 0 : i32
    %c0_i32_1 = arith.constant 0 : i32
    return %c0_i32, %c0_i32_0 : i32, i32
  }
  func.func @transform_15(%arg0: i32) -> (i32, i32) {
    %c0_i32 = arith.constant 0 : i32
    %c0_i32_0 = arith.constant 0 : i32
    %c0_i32_1 = arith.constant 0 : i32
    return %c0_i32, %c0_i32_0 : i32, i32
  }
  func.func @transform_16(%arg0: i32) -> (i32, i32) {
    %c0_i32 = arith.constant 0 : i32
    %c0_i32_0 = arith.constant 0 : i32
    %c0_i32_1 = arith.constant 0 : i32
    return %c0_i32, %c0_i32_0 : i32, i32
  }
  func.func @transform_17(%arg0: i32) -> (i32, i32, i32) {
    %c0_i32 = arith.constant 0 : i32
    %c0_i32_0 = arith.constant 0 : i32
    %c0_i32_1 = arith.constant 0 : i32
    return %c0_i32, %arg0, %c0_i32_0 : i32, i32, i32
  }
  func.func @transform_18(%arg0: i32) -> (i32, i32) {
    %c0_i32 = arith.constant 0 : i32
    %c0_i32_0 = arith.constant 0 : i32
    return %arg0, %c0_i32 : i32, i32
  }
  func.func @transform_19(%arg0: i32) -> (i32, i32) {
    %c0_i32 = arith.constant 0 : i32
    %c0_i32_0 = arith.constant 0 : i32
    return %arg0, %c0_i32 : i32, i32
  }
}

</mosaic_0001>

<bundles_post_ra>
// kernel: tpu_custom_call.1
= control target key start
LH: loop header
LB: loop body
LE: loop exit
PB: predicated region body
PF: predicated region fallthrough
CT: control target
= control target key end

     0   :  { %s2841_s0 = inlined_call_operand.hbm [shape: f32[8,128], index: 0, kind: input, shape index: {}]   ;;  %s2842_s1 = inlined_call_operand.hbm [shape: f32[128,128], index: 1, kind: input, shape index: {}]   ;;  %s2843_s2 = inlined_call_operand.vmem [shape: f32[1,128], index: 2, kind: input, shape index: {}]   ;;  %s2844_s3 = inlined_call_operand.hbm [shape: f32[1,128], index: 3, kind: input, shape index: {}]   ;;  %s2845_s4 = inlined_call_operand.hbm [shape: f32[1,128], index: 4, kind: input, shape index: {}]   ;;  %s2846_s5 = inlined_call_operand.hbm [shape: f32[128,128], index: 5, kind: input, shape index: {}]   ;;  %s2847_s6 = inlined_call_operand.vmem [shape: f32[1,128], index: 6, kind: input, shape index: {}]   ;;  %s2848_s7 = inlined_call_operand.vmem [shape: f32[1,128], index: 7, kind: input, shape index: {}]   ;;  %s2849_s8 = inlined_call_operand.vmem [shape: f32[1,128], index: 8, kind: input, shape index: {}]   ;;  %s2850_s9 = inlined_call_operand.hbm [shape: f32[4,128,128], index: 9, kind: input, shape index: {}]   ;;  %s2851_s10 = inlined_call_operand.vmem [shape: f32[4,1,128], index: 10, kind: input, shape index: {}]   ;;  %s2852_s11 = inlined_call_operand.hbm [shape: f32[4,128,128], index: 11, kind: input, shape index: {}]   ;;  %s2853_s12 = inlined_call_operand.vmem [shape: f32[4,1,128], index: 12, kind: input, shape index: {}]   ;;  %s2854_s13 = inlined_call_operand.hbm [shape: f32[128,128], index: 13, kind: input, shape index: {}]   ;;  %s2855_s14 = inlined_call_operand.vmem [shape: f32[1,128], index: 14, kind: input, shape index: {}]   ;;  %s2856_s15 = inlined_call_operand.hbm [shape: f32[128,128], index: 15, kind: input, shape index: {}]   ;;  %s2857_s16 = inlined_call_operand.vmem [shape: f32[1,128], index: 16, kind: input, shape index: {}]   ;;  %s2858_s17 = inlined_call_operand.hbm [shape: f32[4,8,128], index: 17, kind: output, shape index: {0}]   ;;  %s2859_s18 = inlined_call_operand.hbm [shape: f32[8,128], index: 18, kind: output, shape index: {1}]   ;;  %s2860_s19 = inlined_call_operand.hbm [shape: f32[8,128], index: 19, kind: output, shape index: {2}]  }
   0x1   :  { %2861 = sst [smem:[#allocation28_spill]] %s2841_s0 }
   0x2   :  { %2862 = sst [smem:[#allocation29_spill]] %s2842_s1 }
   0x3   :  { %2863 = sst [smem:[#allocation30_spill]] %s2843_s2 }
   0x4   :  { %2864 = sst [smem:[#allocation31_spill]] %s2844_s3 }
   0x5   :  { %25 = vsyncpa [#allocation3], 0 }
   0x6   :  { %26 = vsyncpa [#allocation6], 0 }
   0x7   :  { %27 = vsyncpa [#allocation9], 0 }
   0x8   :  { %28 = vsyncpa [#allocation12], 0 }
   0x9   :  { %29 = vsyncpa [#allocation15], 0 }
   0xa   :  { %30 = vsyncpa [#allocation4], 0 }
   0xb   :  { %31 = vsyncpa [#allocation19], 0  ;;  %s2395_s0 = smov [#allocation5]  }
   0xc   :  { %s47_s30 = sshll.u32 %s2395_s0, 4  ;;  %s48_s30 = int_to_ptr.vmem [resolvable:$true] %s47_s30 }
   0xd   :  { %s2149_s20 = scalar_lea.vmem %s48_s30, 2048  ;;  %p2154_p1 = scmp.lt.s32.totalorder %s48_s30, %s48_s30 }
   0xe   :  { %p2150_p0 = scmp.ne.s32.totalorder %s48_s30, %s2149_s20  ;;  %p2155_p2 = scmp.lt.s32.totalorder %s2149_s20, %s2149_s20 }
  0x10   :  { %p2156_p3 = por %p2155_p2, %p2154_p1 }
  0x12   :  { %p2157_p4 = pnand %p2156_p3, %p2150_p0 }
  0x14   :  { %2160 = shalt.err (!%p2157_p4)
}
  0x15   :  { %s2396_s21 = smov 128   ;;  %s2397_s1 = smov 8  }
  0x16   :  { %s2865_s23 = sld [smem:[#allocation29_spill]]  ;;  %s2398_s24 = smov [#allocation8]  }
  0x17   :  { %s72_s25 = sshll.u32 %s2398_s24, 4  ;;  %s2399_s3 = smov [#allocation11]   ;;  %s73_s25 = int_to_ptr.vmem [resolvable:$true] %s72_s25 }
  0x18   :  { %s99_s26 = sshll.u32 %s2399_s3, 4  ;;  %s2169_s27 = scalar_lea.vmem %s73_s25, 16  ;;  %s100_s26 = int_to_ptr.vmem [resolvable:$true] %s99_s26 }
  0x19   :  { %p2170_p5 = scmp.ne.s32.totalorder %s73_s25, %s2169_s27  ;;  %s2173_s28 = scalar_lea.vmem %s73_s25, 32 }
  0x1a   :  { %p2174_p6 = scmp.lt.s32.totalorder %s73_s25, %s73_s25  ;;  %p2175_p7 = scmp.lt.s32.totalorder %s2173_s28, %s2169_s27 }
  0x1c   :  { %53 = dma.hbm_to_vmem [thread:$0]  %s2865_s23, 2048, %s48_s30, [#allocation6], %s2396_s21, %s2396_s21, %s2397_s1  }
  0x1d   :  { %p2176_p8 = por %p2175_p7, %p2174_p6 }
  0x1f   :  { %p2177_p9 = pnand %p2176_p8, %p2170_p5 }
  0x21   :  { %2180 = shalt.err (!%p2177_p9)
}
  0x22   :  { %75 = dma.hbm_to_vmem [thread:$0]  %s2845_s4, 16, %s73_s25, [#allocation9]  }
  0x23   :  { %s2189_s20 = scalar_lea.vmem %s100_s26, 8192  ;;  %p2194_p11 = scmp.lt.s32.totalorder %s100_s26, %s100_s26 }
  0x24   :  { %p2190_p10 = scmp.ne.s32.totalorder %s100_s26, %s2189_s20  ;;  %p2195_p12 = scmp.lt.s32.totalorder %s2189_s20, %s2189_s20 }
  0x26   :  { %p2196_p13 = por %p2195_p12, %p2194_p11 }
  0x28   :  { %p2197_p0 = pnand %p2196_p13, %p2190_p10 }
  0x2a   :  { %2200 = shalt.err (!%p2197_p0)
}
  0x2b   :  { %105 = dma.hbm_to_vmem [thread:$0]  %s2850_s9, 8192, %s100_s26, [#allocation12], %s2396_s21, %s2396_s21, %s2397_s1  }
  0x2c   :  { %s2400_s2 = smov [#allocation14]   ;;  %s2401_s24 = smov [#allocation2]  }
  0x2d   :  { %s127_s23 = sshll.u32 %s2400_s2, 4  ;;  %s38_s4 = sshll.u32 %s2401_s24, 4  ;;  %s128_s23 = int_to_ptr.vmem [resolvable:$true] %s127_s23  ;;  %s39_s4 = int_to_ptr.vmem [resolvable:$true] %s38_s4 }
  0x2e   :  { %s2209_s25 = scalar_lea.vmem %s128_s23, 2048  ;;  %p2214_p2 = scmp.lt.s32.totalorder %s128_s23, %s128_s23 }
  0x2f   :  { %p2210_p1 = scmp.ne.s32.totalorder %s128_s23, %s2209_s25  ;;  %p2215_p3 = scmp.lt.s32.totalorder %s2209_s25, %s2209_s25 }
  0x31   :  { %p2216_p4 = por %p2215_p3, %p2214_p2 }
  0x33   :  { %p2217_p5 = pnand %p2216_p4, %p2210_p1 }
  0x35   :  { %2220 = shalt.err (!%p2217_p5)
}
  0x36   :  { %133 = dma.hbm_to_vmem [thread:$0]  %s2854_s13, 2048, %s128_s23, [#allocation15], %s2396_s21, %s2396_s21, %s2397_s1  }
  0x37   :  { %s2229_s9 = scalar_lea.vmem %s39_s4, 128  ;;  %p2234_p7 = scmp.lt.s32.totalorder %s39_s4, %s39_s4 }
  0x38   :  { %p2230_p6 = scmp.ne.s32.totalorder %s39_s4, %s2229_s9  ;;  %p2235_p8 = scmp.lt.s32.totalorder %s2229_s9, %s2229_s9 }
  0x3a   :  { %p2236_p9 = por %p2235_p8, %p2234_p7 }
  0x3c   :  { %p2237_p10 = pnand %p2236_p9, %p2230_p6 }
  0x3e   :  { %2240 = shalt.err (!%p2237_p10)
}
  0x3f   :  { %s2866_s29 = sld [smem:[#allocation28_spill]]  ;;  %s2402_s0 = smov [#allocation7]  }
  0x40   :  { %s62_s20 = sshll.u32 %s2402_s0, 4  ;;  %s2403_s30 = smov [#allocation10]   ;;  %s63_s20 = int_to_ptr.vmem [resolvable:$true] %s62_s20 }
  0x41   :  { %s81_s22 = sshll.u32 %s2403_s30, 4  ;;  %s2249_s2 = scalar_lea.vmem %s63_s20, 16  ;;  %s82_s22 = int_to_ptr.vmem [resolvable:$true] %s81_s22 }
  0x42   :  { %p2250_p11 = scmp.ne.s32.totalorder %s63_s20, %s2249_s2  ;;  %s2253_s13 = scalar_lea.vmem %s63_s20, 32 }
  0x43   :  { %p2254_p12 = scmp.lt.s32.totalorder %s63_s20, %s63_s20  ;;  %p2255_p13 = scmp.lt.s32.totalorder %s2253_s13, %s2249_s2 }
  0x45   :  { %41 = dma.hbm_to_vmem [thread:$0]  %s2866_s29, 128, %s39_s4, [#allocation3]  }
  0x46   :  { %p2256_p0 = por %p2255_p13, %p2254_p12 }
  0x48   :  { %p2257_p1 = pnand %p2256_p0, %p2250_p11 }
  0x4a   :  { %2260 = shalt.err (!%p2257_p1)
}
  0x4b   :  { %s2867_s25 = sld [smem:[#allocation31_spill]]  ;;  %s2269_s3 = scalar_lea.vmem %s82_s22, 2048 }
  0x4c   :  { %p2270_p2 = scmp.ne.s32.totalorder %s82_s22, %s2269_s3  ;;  %p2274_p3 = scmp.lt.s32.totalorder %s82_s22, %s82_s22 }
  0x4d   :  { %p2275_p4 = scmp.lt.s32.totalorder %s2269_s3, %s2269_s3 }
  0x4f   :  { %p2276_p5 = por %p2275_p4, %p2274_p3 }
  0x51   :  { %65 = dma.hbm_to_vmem [thread:$0]  %s2867_s25, 16, %s63_s20, [#allocation6]  }
  0x52   :  { %p2277_p6 = pnand %p2276_p5, %p2270_p2 }
  0x54   :  { %2280 = shalt.err (!%p2277_p6)
}
  0x55   :  { %87 = dma.hbm_to_vmem [thread:$0]  %s2846_s5, 2048, %s82_s22, [#allocation9], %s2396_s21, %s2396_s21, %s2397_s1  }
  0x56   :  { %s2404_s9 = smov [#allocation13]   ;;  %s2405_s28 = smov [#allocation16]  }
  0x57   :  { %s113_s26 = sshll.u32 %s2404_s9, 4  ;;  %s141_s29 = sshll.u32 %s2405_s28, 4  ;;  %s114_s26 = int_to_ptr.vmem [resolvable:$true] %s113_s26  ;;  %s142_s29 = int_to_ptr.vmem [resolvable:$true] %s141_s29 }
  0x58   :  { %s2289_s0 = scalar_lea.vmem %s114_s26, 8192  ;;  %p2294_p8 = scmp.lt.s32.totalorder %s114_s26, %s114_s26 }
  0x59   :  { %p2290_p7 = scmp.ne.s32.totalorder %s114_s26, %s2289_s0  ;;  %p2295_p9 = scmp.lt.s32.totalorder %s2289_s0, %s2289_s0 }
  0x5b   :  { %p2296_p10 = por %p2295_p9, %p2294_p8 }
  0x5d   :  { %p2297_p11 = pnand %p2296_p10, %p2290_p7 }
  0x5f   :  { %2300 = shalt.err (!%p2297_p11)
}
  0x60   :  { %119 = dma.hbm_to_vmem [thread:$0]  %s2852_s11, 8192, %s114_s26, [#allocation12], %s2396_s21, %s2396_s21, %s2397_s1  }
  0x61   :  { %s2309_s5 = scalar_lea.vmem %s142_s29, 2048  ;;  %p2314_p13 = scmp.lt.s32.totalorder %s142_s29, %s142_s29 }
  0x62   :  { %p2310_p12 = scmp.ne.s32.totalorder %s142_s29, %s2309_s5  ;;  %p2315_p0 = scmp.lt.s32.totalorder %s2309_s5, %s2309_s5 }
  0x64   :  { %p2316_p1 = por %p2315_p0, %p2314_p13 }
  0x66   :  { %p2317_p2 = pnand %p2316_p1, %p2310_p12 }
  0x68   :  { %2320 = shalt.err (!%p2317_p2)
}
  0x69   :  { %147 = dma.hbm_to_vmem [thread:$0]  %s2856_s15, 2048, %s142_s29, [#allocation15], %s2396_s21, %s2396_s21, %s2397_s1  }
  0x6a   :  { %2381 = dma.done.wait [#allocation3], 128  }
  0x6b   :  { %2382 = vsyncadd [#allocation3], 4294967168 }
  0x6c   :  { %2383 = dma.done.wait [#allocation6], 2064  }
  0x6d   :  { %2384 = vsyncadd [#allocation6], 4294965232 }
  0x6e   :  { %2385 = dma.done.wait [#allocation9], 2064  }
  0x6f   :  { %2386 = vsyncadd [#allocation9], 4294965232 }
  0x70   :  { %2387 = dma.done.wait [#allocation12], 16384  }
  0x71   :  { %2388 = vsyncadd [#allocation12], 4294950912 }
  0x72   :  { %2389 = dma.done.wait [#allocation15], 4096  }
  0x73   :  { %2390 = vsyncadd [#allocation15], 4294963200  ;;  %v2406_v0 = vmov 0.0   ;;  %vm2407_vm0 = vmmov 0   ;;  %v193_v1 = vld [vmem:[#allocation5 + $0x78] sm:$0xff]  ;;  %v192_v2 = vld [vmem:[#allocation5 + $0x70] sm:$0xff] }
  0x74   :  { %1688 = vmatprep.subr.mxu0 %v2406_v0  ;;  %1720 = vmatprep.mubr.msk.f32.mxu0 %vm2407_vm0, %v2406_v0  ;;  %v191_v3 = vld [vmem:[#allocation5 + $0x68] sm:$0xff]  ;;  %v190_v4 = vld [vmem:[#allocation5 + $0x60] sm:$0xff]  ;;  %v189_v5 = vld [vmem:[#allocation5 + $0x58] sm:$0xff]  ;;  %s2868_s13 = sld [smem:[#allocation30_spill]] }
  0x75   :  { %1723 = vmatprep.subr.mxu1 %v2406_v0  ;;  %1755 = vmatprep.mubr.msk.f32.mxu1 %vm2407_vm0, %v2406_v0  ;;  %v188_v6 = vld [vmem:[#allocation5 + $0x50] sm:$0xff]  ;;  %v187_v7 = vld [vmem:[#allocation5 + $0x48] sm:$0xff]  ;;  %v186_v8 = vld [vmem:[#allocation5 + $0x40] sm:$0xff] }
  0x76   :  { %1689 = vmatpush3.msra.mxu0 %v193_v1  ;;  %v185_v9 = vld [vmem:[#allocation5 + $0x38] sm:$0xff]  ;;  %v184_v10 = vld [vmem:[#allocation5 + $0x30] sm:$0xff]  ;;  %v183_v11 = vld [vmem:[#allocation5 + $0x28] sm:$0xff] }
  0x77   :  { %1690 = vmatprep.subr.mxu0 %v2406_v0  ;;  %v182_v12 = vld [vmem:[#allocation5 + $0x20] sm:$0xff]  ;;  %v181_v13 = vld [vmem:[#allocation5 + $0x18] sm:$0xff]  ;;  %v180_v14 = vld [vmem:[#allocation5 + $0x10] sm:$0xff] }
  0x78   :  { %1691 = vmatpush3.msra.mxu0 %v192_v2  ;;  %v179_v15 = vld [vmem:[#allocation5 + $0x8] sm:$0xff]  ;;  %v178_v16 = vld [vmem:[#allocation5] sm:$0xff]  ;;  %v177_v17 = vld [vmem:[#allocation2] sm:$0xff] }
  0x79   :  { %1692 = vmatprep.subr.mxu0 %v2406_v0  ;;  %v315_v22 = vld [vmem:[#allocation10 + $0x78] sm:$0xff]  ;;  %v314_v23 = vld [vmem:[#allocation10 + $0x70] sm:$0xff]  ;;  %v313_v24 = vld [vmem:[#allocation10 + $0x68] sm:$0xff] }
  0x7a   :  { %1693 = vmatpush3.msra.mxu0 %v191_v3  ;;  %v1462_v18 = vld [vmem:[%s2868_s13] ss:$0 sm:$0xff]  ;;  %1724 = vmatpush3.msra.mxu1 %v315_v22  ;;  %v312_v29 = vld [vmem:[#allocation10 + $0x60] sm:$0xff]  ;;  %v311_v30 = vld [vmem:[#allocation10 + $0x58] sm:$0xff] }
  0x7b   :  { %1694 = vmatprep.subr.mxu0 %v2406_v0  ;;  %1725 = vmatprep.subr.mxu1 %v2406_v0  ;;  %v310_v31 = vld [vmem:[#allocation10 + $0x50] sm:$0xff]  ;;  %v309_v32 = vld [vmem:[#allocation10 + $0x48] sm:$0xff]  ;;  %v308_v33 = vld [vmem:[#allocation10 + $0x40] sm:$0xff] }
  0x7c   :  { %1695 = vmatpush3.msra.mxu0 %v190_v4  ;;  %1726 = vmatpush3.msra.mxu1 %v314_v23  ;;  %v307_v34 = vld [vmem:[#allocation10 + $0x38] sm:$0xff]  ;;  %v306_v35 = vld [vmem:[#allocation10 + $0x30] sm:$0xff]  ;;  %v305_v36 = vld [vmem:[#allocation10 + $0x28] sm:$0xff] }
  0x7d   :  { %1696 = vmatprep.subr.mxu0 %v2406_v0  ;;  %1727 = vmatprep.subr.mxu1 %v2406_v0  ;;  %v304_v37 = vld [vmem:[#allocation10 + $0x20] sm:$0xff]  ;;  %v303_v38 = vld [vmem:[#allocation10 + $0x18] sm:$0xff]  ;;  %v302_v39 = vld [vmem:[#allocation10 + $0x10] sm:$0xff] }
  0x7e   :  { %1697 = vmatpush3.msra.mxu0 %v189_v5  ;;  %1728 = vmatpush3.msra.mxu1 %v313_v24  ;;  %v301_v40 = vld [vmem:[#allocation10 + $0x8] sm:$0xff]  ;;  %v300_v41 = vld [vmem:[#allocation10] sm:$0xff]  ;;  %v1463_v46 = vld [vmem:[#allocation7] ss:$0 sm:$0xff] }
  0x7f   :  { %1698 = vmatprep.subr.mxu0 %v2406_v0  ;;  %1729 = vmatprep.subr.mxu1 %v2406_v0  ;;  %v1464_v48 = vld [vmem:[#allocation8] ss:$0 sm:$0xff]  ;;  %v1465_v52 = vld [vmem:[%s2847_s6] ss:$0 sm:$0xff]  ;;  %v434_v58 = vld [vmem:[#allocation11 + $0x68] sm:$0xff] }
  0x80   :  { %1699 = vmatpush3.msra.mxu0 %v188_v6  ;;  %1730 = vmatpush3.msra.mxu1 %v312_v29  ;;  %v436_v56 = vld [vmem:[#allocation11 + $0x78] sm:$0xff]  ;;  %v435_v57 = vld [vmem:[#allocation11 + $0x70] sm:$0xff]  ;;  %v433_v63 = vld [vmem:[#allocation11 + $0x60] sm:$0xff] }
  0x81   :  { %1700 = vmatprep.subr.mxu0 %v2406_v0  ;;  %1731 = vmatprep.subr.mxu1 %v2406_v0  ;;  %v432_v1 = vld [vmem:[#allocation11 + $0x58] sm:$0xff]  ;;  %v431_v2 = vld [vmem:[#allocation11 + $0x50] sm:$0xff]  ;;  %v430_v3 = vld [vmem:[#allocation11 + $0x48] sm:$0xff] }
  0x82   :  { %1701 = vmatpush3.msra.mxu0 %v187_v7  ;;  %1732 = vmatpush3.msra.mxu1 %v311_v30  ;;  %v429_v4 = vld [vmem:[#allocation11 + $0x40] sm:$0xff]  ;;  %v428_v5 = vld [vmem:[#allocation11 + $0x38] sm:$0xff]  ;;  %v427_v6 = vld [vmem:[#allocation11 + $0x30] sm:$0xff] }
  0x83   :  { %1702 = vmatprep.subr.mxu0 %v2406_v0  ;;  %1733 = vmatprep.subr.mxu1 %v2406_v0  ;;  %v426_v7 = vld [vmem:[#allocation11 + $0x28] sm:$0xff]  ;;  %v625_v23 = vld [vmem:[#allocation11 + $0xf8] sm:$0xff]  ;;  %v624_v24 = vld [vmem:[#allocation11 + $0xf0] sm:$0xff] }
  0x84   :  { %1703 = vmatpush3.msra.mxu0 %v186_v8  ;;  %1734 = vmatpush3.msra.mxu1 %v310_v31  ;;  %v425_v8 = vld [vmem:[#allocation11 + $0x20] sm:$0xff]  ;;  %v621_v31 = vld [vmem:[#allocation11 + $0xd8] sm:$0xff] }
  0x85   :  { %1704 = vmatprep.subr.mxu0 %v2406_v0  ;;  %1735 = vmatprep.subr.mxu1 %v2406_v0  ;;  %v622_v29 = vld [vmem:[#allocation11 + $0xe0] sm:$0xff] }
  0x86   :  { %1705 = vmatpush3.msra.mxu0 %v185_v9  ;;  %1736 = vmatpush3.msra.mxu1 %v309_v32  ;;  %v424_v9 = vld [vmem:[#allocation11 + $0x18] sm:$0xff]  ;;  %v527_v30 = vld [vmem:[#allocation13 + $0x60] sm:$0xff] }
  0x87   :  { %1706 = vmatprep.subr.mxu0 %v2406_v0  ;;  %1737 = vmatprep.subr.mxu1 %v2406_v0  ;;  %v526_v32 = vld [vmem:[#allocation13 + $0x58] sm:$0xff] }
  0x88   :  { %1707 = vmatpush3.msra.mxu0 %v184_v10  ;;  %1738 = vmatpush3.msra.mxu1 %v308_v33  ;;  %v423_v10 = vld [vmem:[#allocation11 + $0x10] sm:$0xff] }
  0x89   :  { %1708 = vmatprep.subr.mxu0 %v2406_v0  ;;  %1739 = vmatprep.subr.mxu1 %v2406_v0  ;;  %v620_v33 = vld [vmem:[#allocation11 + $0xd0] sm:$0xff] }
  0x8a   :  { %1709 = vmatpush3.msra.mxu0 %v183_v11  ;;  %1740 = vmatpush3.msra.mxu1 %v307_v34  ;;  %v422_v11 = vld [vmem:[#allocation11 + $0x8] sm:$0xff]  ;;  %v525_v34 = vld [vmem:[#allocation13 + $0x50] sm:$0xff] }
  0x8b   :  { %1710 = vmatprep.subr.mxu0 %v2406_v0  ;;  %1741 = vmatprep.subr.mxu1 %v2406_v0 }
  0x8c   :  { %1711 = vmatpush3.msra.mxu0 %v182_v12  ;;  %1742 = vmatpush3.msra.mxu1 %v306_v35  ;;  %v421_v12 = vld [vmem:[#allocation11] sm:$0xff]  ;;  %v619_v35 = vld [vmem:[#allocation11 + $0xc8] sm:$0xff] }
  0x8d   :  { %1712 = vmatprep.subr.mxu0 %v2406_v0  ;;  %1743 = vmatprep.subr.mxu1 %v2406_v0 }
  0x8e   :  { %1713 = vmatpush3.msra.mxu0 %v181_v13  ;;  %1744 = vmatpush3.msra.mxu1 %v305_v36  ;;  %v524_v36 = vld [vmem:[#allocation13 + $0x48] sm:$0xff] }
  0x8f   :  { %1714 = vmatprep.subr.mxu0 %v2406_v0  ;;  %1745 = vmatprep.subr.mxu1 %v2406_v0 }
  0x90   :  { %1715 = vmatpush3.msra.mxu0 %v180_v14  ;;  %1746 = vmatpush3.msra.mxu1 %v304_v37  ;;  %v618_v37 = vld [vmem:[#allocation11 + $0xc0] sm:$0xff] }
  0x91   :  { %1716 = vmatprep.subr.mxu0 %v2406_v0  ;;  %1747 = vmatprep.subr.mxu1 %v2406_v0 }
  0x92   :  { %1717 = vmatpush3.msra.mxu0 %v179_v15  ;;  %1748 = vmatpush3.msra.mxu1 %v303_v38  ;;  %v523_v38 = vld [vmem:[#allocation13 + $0x40] sm:$0xff] }
  0x93   :  { %1718 = vmatprep.subr.mxu0 %v2406_v0  ;;  %1749 = vmatprep.subr.mxu1 %v2406_v0 }
  0x94   :  { %1719 = vmatpush3.msra.mxu0 %v178_v16  ;;  %1750 = vmatpush3.msra.mxu1 %v302_v39  ;;  %v617_v39 = vld [vmem:[#allocation11 + $0xb8] sm:$0xff] }
  0x95   :  { %1721 = vmatmul.mubr.f32.vlgmr.msra.gmra.mxu0 %v177_v17  ;;  %1758 = vmatprep.subr.mxu0 %v2406_v0  ;;  %v1466_v17 = vld [vmem:[%s2848_s7] ss:$0 sm:$0xff] }
  0x96   :  { %1790 = vmatprep.mubr.msk.f32.mxu0 %vm2407_vm0, %v2406_v0  ;;  %1751 = vmatprep.subr.mxu1 %v2406_v0 }
  0x97   :  { %1752 = vmatpush3.msra.mxu1 %v301_v40  ;;  %1759 = vmatpush3.msra.mxu0 %v436_v56  ;;  %v522_v40 = vld [vmem:[#allocation13 + $0x38] sm:$0xff]  ;;  %v815_v56 = vld [vmem:[#allocation11 + $0x160] sm:$0xff] }
  0x98   :  { %1753 = vmatprep.subr.mxu1 %v2406_v0  ;;  %1760 = vmatprep.subr.mxu0 %v2406_v0 }
  0x99   :  { %1754 = vmatpush3.msra.mxu1 %v300_v41  ;;  %1761 = vmatpush3.msra.mxu0 %v435_v57  ;;  %v616_v41 = vld [vmem:[#allocation11 + $0xb0] sm:$0xff]  ;;  %v814_v57 = vld [vmem:[#allocation11 + $0x158] sm:$0xff] }
  0x9a   :  { %1793 = vmatprep.subr.mxu1 %v2406_v0  ;;  %1762 = vmatprep.subr.mxu0 %v2406_v0 }
  0x9b   :  { %1763 = vmatpush3.msra.mxu0 %v434_v58  ;;  %v813_v58 = vld [vmem:[#allocation11 + $0x150] sm:$0xff] }
  0x9c   :  { %1764 = vmatprep.subr.mxu0 %v2406_v0 }
  0x9d   :  { %1765 = vmatpush3.msra.mxu0 %v433_v63  ;;  %v808_v63 = vld [vmem:[#allocation11 + $0x128] sm:$0xff] }
  0x9e   :  { %1766 = vmatprep.subr.mxu0 %v2406_v0 }
  0x9f   :  { %1767 = vmatpush3.msra.mxu0 %v432_v1  ;;  %v807_v1 = vld [vmem:[#allocation11 + $0x120] sm:$0xff] }
  0xa0   :  { %1768 = vmatprep.subr.mxu0 %v2406_v0 }
  0xa1   :  { %1769 = vmatpush3.msra.mxu0 %v431_v2  ;;  %v806_v2 = vld [vmem:[#allocation11 + $0x118] sm:$0xff] }
  0xa2   :  { %1770 = vmatprep.subr.mxu0 %v2406_v0 }
  0xa3   :  { %1771 = vmatpush3.msra.mxu0 %v430_v3  ;;  %v805_v3 = vld [vmem:[#allocation11 + $0x110] sm:$0xff] }
  0xa4   :  { %1772 = vmatprep.subr.mxu0 %v2406_v0 }
  0xa5   :  { %1773 = vmatpush3.msra.mxu0 %v429_v4  ;;  %v804_v4 = vld [vmem:[#allocation11 + $0x108] sm:$0xff] }
  0xa6   :  { %1774 = vmatprep.subr.mxu0 %v2406_v0 }
  0xa7   :  { %1775 = vmatpush3.msra.mxu0 %v428_v5  ;;  %v803_v5 = vld [vmem:[#allocation11 + $0x100] sm:$0xff] }
  0xa8   :  { %1776 = vmatprep.subr.mxu0 %v2406_v0 }
  0xa9   :  { %1777 = vmatpush3.msra.mxu0 %v427_v6  ;;  %v1011_v6 = vld [vmem:[#allocation11 + $0x1f8] sm:$0xff] }
  0xaa   :  { %1778 = vmatprep.subr.mxu0 %v2406_v0 }
  0xab   :  { %1779 = vmatpush3.msra.mxu0 %v426_v7  ;;  %v1010_v7 = vld [vmem:[#allocation11 + $0x1f0] sm:$0xff] }
  0xac   :  { %1780 = vmatprep.subr.mxu0 %v2406_v0 }
  0xad   :  { %1781 = vmatpush3.msra.mxu0 %v425_v8  ;;  %v516_v8 = vld [vmem:[#allocation13 + $0x8] sm:$0xff] }
  0xae   :  { %1782 = vmatprep.subr.mxu0 %v2406_v0 }
  0xaf   :  { %1783 = vmatpush3.msra.mxu0 %v424_v9  ;;  %v1009_v9 = vld [vmem:[#allocation11 + $0x1e8] sm:$0xff] }
  0xb0   :  { %1784 = vmatprep.subr.mxu0 %v2406_v0 }
  0xb1   :  { %1785 = vmatpush3.msra.mxu0 %v423_v10  ;;  %v515_v10 = vld [vmem:[#allocation13] sm:$0xff] }
  0xb2   :  { %1786 = vmatprep.subr.mxu0 %v2406_v0 }
  0xb3   :  { %1787 = vmatpush3.msra.mxu0 %v422_v11  ;;  %v1008_v11 = vld [vmem:[#allocation11 + $0x1e0] sm:$0xff] }
  0xb4   :  { %1788 = vmatprep.subr.mxu0 %v2406_v0 }
  0xb5   :  { %1789 = vmatpush3.msra.mxu0 %v421_v12  ;;  %v1007_v12 = vld [vmem:[#allocation11 + $0x1d8] sm:$0xff] }
  0xb6   :  { %1828 = vmatprep.subr.mxu0 %v2406_v0 }
 0x155   :  { %v267_v19 = vpop.f32.mrf.mxu0 }
 0x156   :  { %v268_v20 = vadd.f32 %v1462_v18, %v267_v19  ;;  %v1467_v19 = vld [vmem:[%s2849_s8] ss:$0 sm:$0xff] }
 0x157   :  { %v1722_v21 = vpop.f32.mrf.mxu0 }
 0x158   :  { %273 = vadd.xlane.f32.xlu0 %v268_v20 }
 0x1e1   :  { %v274_v25 = vpop.xlane.xlu0 %273 }
 0x1e2   :  { %v276_v26 = vmul.f32 0.0078125, %v274_v25  ;;  %v530_v25 = vld [vmem:[#allocation13 + $0x78] sm:$0xff] }
 0x1e4   :  { %v277_v27 = vsub.f32 %v268_v20, %v276_v26  ;;  %v529_v26 = vld [vmem:[#allocation13 + $0x70] sm:$0xff] }
 0x1e6   :  { %v278_v28 = vmul.f32 %v277_v27, %v277_v27 }
 0x1e8   :  { %279 = vadd.xlane.f32.xlu0 %v278_v28  ;;  %v528_v28 = vld [vmem:[#allocation13 + $0x68] sm:$0xff] }
 0x271   :  { %v280_v42 = vpop.xlane.xlu0 %279 }
 0x272   :  { %v281_v43 = vmul.f32 0.0078125, %v280_v42  ;;  %v521_v42 = vld [vmem:[#allocation13 + $0x30] sm:$0xff] }
 0x274   :  { %v282_v44 = vadd.f32 1e-05, %v281_v43  ;;  %v615_v43 = vld [vmem:[#allocation11 + $0xa8] sm:$0xff] }
 0x276   :  { %2133 = vrsqrt.f32 %v282_v44  ;;  %v520_v44 = vld [vmem:[#allocation13 + $0x28] sm:$0xff] }
 0x283   :  { %v2134_v45 = vpop.eup %2133 }
 0x284   :  { %v284_v47 = vmul.f32 %v2134_v45, %v277_v27  ;;  %v623_v27 = vld [vmem:[#allocation11 + $0xe8] sm:$0xff]  ;;  %v614_v45 = vld [vmem:[#allocation11 + $0xa0] sm:$0xff] }
 0x286   :  { %v291_v49 = vmul.f32 %v1463_v46, %v284_v47  ;;  %v519_v46 = vld [vmem:[#allocation13 + $0x20] sm:$0xff]  ;;  %v613_v47 = vld [vmem:[#allocation11 + $0x98] sm:$0xff] }
 0x288   :  { %v298_v50 = vadd.f32 %v1464_v48, %v291_v49  ;;  %v518_v48 = vld [vmem:[#allocation13 + $0x18] sm:$0xff]  ;;  %v612_v49 = vld [vmem:[#allocation11 + $0x90] sm:$0xff] }
 0x28a   :  { %v299_v51 = vmax.f32 %v298_v50, 0.0  ;;  %v517_v50 = vld [vmem:[#allocation13 + $0x10] sm:$0xff] }
 0x28c   :  { %1756 = vmatmul.mubr.f32.vlgmr.msra.gmra.mxu1 %v299_v51  ;;  %v611_v51 = vld [vmem:[#allocation11 + $0x88] sm:$0xff] }
 0x28d   :  { %1825 = vmatprep.mubr.msk.f32.mxu1 %vm2407_vm0, %v2406_v0  ;;  %1794 = vmatpush3.msra.mxu1 %v530_v25  ;;  %v1203_v25 = vld [vmem:[#allocation14 + $0x78] sm:$0xff] }
 0x28e   :  { %1795 = vmatprep.subr.mxu1 %v2406_v0 }
 0x28f   :  { %1796 = vmatpush3.msra.mxu1 %v529_v26  ;;  %v1202_v26 = vld [vmem:[#allocation14 + $0x70] sm:$0xff] }
 0x290   :  { %1797 = vmatprep.subr.mxu1 %v2406_v0 }
 0x291   :  { %1798 = vmatpush3.msra.mxu1 %v528_v28  ;;  %v1200_v28 = vld [vmem:[#allocation14 + $0x60] sm:$0xff] }
 0x292   :  { %1799 = vmatprep.subr.mxu1 %v2406_v0 }
 0x293   :  { %1800 = vmatpush3.msra.mxu1 %v527_v30  ;;  %v1198_v30 = vld [vmem:[#allocation14 + $0x50] sm:$0xff] }
 0x294   :  { %1801 = vmatprep.subr.mxu1 %v2406_v0 }
 0x295   :  { %1802 = vmatpush3.msra.mxu1 %v526_v32  ;;  %v1196_v32 = vld [vmem:[#allocation14 + $0x40] sm:$0xff] }
 0x296   :  { %1803 = vmatprep.subr.mxu1 %v2406_v0 }
 0x297   :  { %1804 = vmatpush3.msra.mxu1 %v525_v34  ;;  %v1194_v34 = vld [vmem:[#allocation14 + $0x30] sm:$0xff] }
 0x298   :  { %1805 = vmatprep.subr.mxu1 %v2406_v0 }
 0x299   :  { %1806 = vmatpush3.msra.mxu1 %v524_v36  ;;  %v1192_v36 = vld [vmem:[#allocation14 + $0x20] sm:$0xff] }
 0x29a   :  { %1807 = vmatprep.subr.mxu1 %v2406_v0 }
 0x29b   :  { %1808 = vmatpush3.msra.mxu1 %v523_v38  ;;  %v1190_v38 = vld [vmem:[#allocation14 + $0x10] sm:$0xff] }
 0x29c   :  { %1809 = vmatprep.subr.mxu1 %v2406_v0 }
 0x29d   :  { %1810 = vmatpush3.msra.mxu1 %v522_v40  ;;  %v1188_v40 = vld [vmem:[#allocation14] sm:$0xff] }
 0x29e   :  { %1811 = vmatprep.subr.mxu1 %v2406_v0 }
 0x29f   :  { %1812 = vmatpush3.msra.mxu1 %v521_v42 }
 0x2a0   :  { %1813 = vmatprep.subr.mxu1 %v2406_v0 }
 0x2a1   :  { %1814 = vmatpush3.msra.mxu1 %v520_v44 }
 0x2a2   :  { %1815 = vmatprep.subr.mxu1 %v2406_v0 }
 0x2a3   :  { %1816 = vmatpush3.msra.mxu1 %v519_v46  ;;  %v721_v46 = vld [vmem:[#allocation13 + $0xf8] sm:$0xff] }
 0x2a4   :  { %1817 = vmatprep.subr.mxu1 %v2406_v0 }
 0x2a5   :  { %1818 = vmatpush3.msra.mxu1 %v518_v48  ;;  %v719_v48 = vld [vmem:[#allocation13 + $0xe8] sm:$0xff] }
 0x2a6   :  { %1819 = vmatprep.subr.mxu1 %v2406_v0 }
 0x2a7   :  { %1820 = vmatpush3.msra.mxu1 %v517_v50  ;;  %v716_v50 = vld [vmem:[#allocation13 + $0xd0] sm:$0xff] }
 0x2a8   :  { %1821 = vmatprep.subr.mxu1 %v2406_v0 }
 0x2a9   :  { %1822 = vmatpush3.msra.mxu1 %v516_v8  ;;  %v909_v8 = vld [vmem:[#allocation13 + $0x150] sm:$0xff] }
 0x2aa   :  { %1823 = vmatprep.subr.mxu1 %v2406_v0 }
 0x2ab   :  { %1824 = vmatpush3.msra.mxu1 %v515_v10  ;;  %v907_v10 = vld [vmem:[#allocation13 + $0x140] sm:$0xff] }
 0x2ac   :  { %1863 = vmatprep.subr.mxu1 %v2406_v0 }
 0x34c   :  { %v389_v53 = vpop.f32.mrf.mxu1 }
 0x34d   :  { %v390_v54 = vadd.f32 %v1465_v52, %v389_v53  ;;  %v610_v52 = vld [vmem:[#allocation11 + $0x80] sm:$0xff]  ;;  %v818_v53 = vld [vmem:[#allocation11 + $0x178] sm:$0xff] }
 0x34e   :  { %v1757_v55 = vpop.f32.mrf.mxu1 }
 0x34f   :  { %395 = vadd.xlane.f32.xlu1 %v390_v54  ;;  %v816_v55 = vld [vmem:[#allocation11 + $0x168] sm:$0xff] }
 0x3d8   :  { %v396_v59 = vpop.xlane.xlu1 %395 }
 0x3d9   :  { %v397_v60 = vmul.f32 0.0078125, %v396_v59  ;;  %v812_v59 = vld [vmem:[#allocation11 + $0x148] sm:$0xff] }
 0x3db   :  { %v398_v61 = vsub.f32 %v390_v54, %v397_v60  ;;  %v817_v54 = vld [vmem:[#allocation11 + $0x170] sm:$0xff]  ;;  %v811_v60 = vld [vmem:[#allocation11 + $0x140] sm:$0xff] }
 0x3dd   :  { %v399_v62 = vmul.f32 %v398_v61, %v398_v61 }
 0x3df   :  { %400 = vadd.xlane.f32.xlu1 %v399_v62  ;;  %v809_v62 = vld [vmem:[#allocation11 + $0x130] sm:$0xff] }
 0x468   :  { %v401_v13 = vpop.xlane.xlu1 %400 }
 0x469   :  { %v402_v14 = vmul.f32 0.0078125, %v401_v13  ;;  %v1006_v13 = vld [vmem:[#allocation11 + $0x1d0] sm:$0xff] }
 0x46b   :  { %v403_v15 = vadd.f32 1e-05, %v402_v14  ;;  %v1005_v14 = vld [vmem:[#allocation11 + $0x1c8] sm:$0xff] }
 0x46d   :  { %2135 = vrsqrt.f32 %v403_v15  ;;  %v1004_v15 = vld [vmem:[#allocation11 + $0x1c0] sm:$0xff] }
 0x47a   :  { %v2136_v16 = vpop.eup %2135 }
 0x47b   :  { %v405_v18 = vmul.f32 %v2136_v16, %v398_v61  ;;  %v810_v61 = vld [vmem:[#allocation11 + $0x138] sm:$0xff] }
 0x47c   :  { %v1003_v16 = vld [vmem:[#allocation11 + $0x1b8] sm:$0xff] }
 0x47d   :  { %v412_v20 = vmul.f32 %v1466_v17, %v405_v18  ;;  %v1002_v17 = vld [vmem:[#allocation11 + $0x1b0] sm:$0xff]  ;;  %v1001_v18 = vld [vmem:[#allocation11 + $0x1a8] sm:$0xff] }
 0x47f   :  { %v419_v21 = vadd.f32 %v1467_v19, %v412_v20  ;;  %v1000_v19 = vld [vmem:[#allocation11 + $0x1a0] sm:$0xff]  ;;  %v999_v20 = vld [vmem:[#allocation11 + $0x198] sm:$0xff] }
 0x481   :  { %v2630_v22 = vmax.f32 %v419_v21, 0.0  ;;  %v998_v21 = vld [vmem:[#allocation11 + $0x190] sm:$0xff] }
 0x483   :  { %1791 = vmatmul.mubr.f32.vlgmr.msra.gmra.mxu0 %v2630_v22 }
 0x484   :  { %1829 = vmatpush3.msra.mxu0 %v625_v23  ;;  %1860 = vmatprep.mubr.msk.f32.mxu0 %vm2407_vm0, %v2406_v0  ;;  %v997_v23 = vld [vmem:[#allocation11 + $0x188] sm:$0xff] }
 0x485   :  { %1830 = vmatprep.subr.mxu0 %v2406_v0 }
 0x486   :  { %1831 = vmatpush3.msra.mxu0 %v624_v24  ;;  %v996_v24 = vld [vmem:[#allocation11 + $0x180] sm:$0xff] }
 0x487   :  { %1832 = vmatprep.subr.mxu0 %v2406_v0 }
 0x488   :  { %1833 = vmatpush3.msra.mxu0 %v623_v27  ;;  %v1201_v27 = vld [vmem:[#allocation14 + $0x68] sm:$0xff] }
 0x489   :  { %1834 = vmatprep.subr.mxu0 %v2406_v0 }
 0x48a   :  { %1835 = vmatpush3.msra.mxu0 %v622_v29  ;;  %v1199_v29 = vld [vmem:[#allocation14 + $0x58] sm:$0xff] }
 0x48b   :  { %1836 = vmatprep.subr.mxu0 %v2406_v0 }
 0x48c   :  { %1837 = vmatpush3.msra.mxu0 %v621_v31  ;;  %v1197_v31 = vld [vmem:[#allocation14 + $0x48] sm:$0xff] }
 0x48d   :  { %1838 = vmatprep.subr.mxu0 %v2406_v0 }
 0x48e   :  { %1839 = vmatpush3.msra.mxu0 %v620_v33  ;;  %v1195_v33 = vld [vmem:[#allocation14 + $0x38] sm:$0xff] }
 0x48f   :  { %1840 = vmatprep.subr.mxu0 %v2406_v0 }
 0x490   :  { %1841 = vmatpush3.msra.mxu0 %v619_v35  ;;  %v1193_v35 = vld [vmem:[#allocation14 + $0x28] sm:$0xff] }
 0x491   :  { %1842 = vmatprep.subr.mxu0 %v2406_v0 }
 0x492   :  { %1843 = vmatpush3.msra.mxu0 %v618_v37  ;;  %v1191_v37 = vld [vmem:[#allocation14 + $0x18] sm:$0xff] }
 0x493   :  { %1844 = vmatprep.subr.mxu0 %v2406_v0 }
 0x494   :  { %1845 = vmatpush3.msra.mxu0 %v617_v39  ;;  %v1189_v39 = vld [vmem:[#allocation14 + $0x8] sm:$0xff] }
 0x495   :  { %1846 = vmatprep.subr.mxu0 %v2406_v0 }
 0x496   :  { %1847 = vmatpush3.msra.mxu0 %v616_v41  ;;  %v1468_v41 = vld [vmem:[%s2851_s10] ss:$0 sm:$0xff] }
 0x497   :  { %1848 = vmatprep.subr.mxu0 %v2406_v0 }
 0x498   :  { %1849 = vmatpush3.msra.mxu0 %v615_v43 }
 0x499   :  { %1850 = vmatprep.subr.mxu0 %v2406_v0 }
 0x49a   :  { %1851 = vmatpush3.msra.mxu0 %v614_v45 }
 0x49b   :  { %1852 = vmatprep.subr.mxu0 %v2406_v0 }
 0x49c   :  { %1853 = vmatpush3.msra.mxu0 %v613_v47  ;;  %v720_v47 = vld [vmem:[#allocation13 + $0xf0] sm:$0xff] }
 0x49d   :  { %1854 = vmatprep.subr.mxu0 %v2406_v0 }
 0x49e   :  { %1855 = vmatpush3.msra.mxu0 %v612_v49  ;;  %v717_v49 = vld [vmem:[#allocation13 + $0xd8] sm:$0xff] }
 0x49f   :  { %1856 = vmatprep.subr.mxu0 %v2406_v0 }
 0x4a0   :  { %1857 = vmatpush3.msra.mxu0 %v611_v51  ;;  %v715_v51 = vld [vmem:[#allocation13 + $0xc8] sm:$0xff] }
 0x4a1   :  { %1858 = vmatprep.subr.mxu0 %v2406_v0 }
 0x4a2   :  { %1859 = vmatpush3.msra.mxu0 %v610_v52  ;;  %v714_v52 = vld [vmem:[#allocation13 + $0xc0] sm:$0xff] }
 0x4a3   :  { %1861 = vmatmul.mubr.f32.vlgmr.msra.gmra.mxu0 %v2630_v22  ;;  %1898 = vmatprep.subr.mxu0 %v2406_v0 }
 0x4a4   :  { %1899 = vmatpush3.msra.mxu0 %v818_v53  ;;  %1930 = vmatprep.mubr.msk.f32.mxu0 %vm2407_vm0, %v2406_v0  ;;  %v713_v53 = vld [vmem:[#allocation13 + $0xb8] sm:$0xff] }
 0x4a5   :  { %1900 = vmatprep.subr.mxu0 %v2406_v0 }
 0x4a6   :  { %1901 = vmatpush3.msra.mxu0 %v817_v54  ;;  %v712_v54 = vld [vmem:[#allocation13 + $0xb0] sm:$0xff] }
 0x4a7   :  { %1902 = vmatprep.subr.mxu0 %v2406_v0 }
 0x4a8   :  { %1903 = vmatpush3.msra.mxu0 %v816_v55  ;;  %v711_v55 = vld [vmem:[#allocation13 + $0xa8] sm:$0xff] }
 0x4a9   :  { %1904 = vmatprep.subr.mxu0 %v2406_v0 }
 0x4aa   :  { %1905 = vmatpush3.msra.mxu0 %v815_v56  ;;  %v710_v56 = vld [vmem:[#allocation13 + $0xa0] sm:$0xff] }
 0x4ab   :  { %1906 = vmatprep.subr.mxu0 %v2406_v0 }
 0x4ac   :  { %1907 = vmatpush3.msra.mxu0 %v814_v57  ;;  %v709_v57 = vld [vmem:[#allocation13 + $0x98] sm:$0xff] }
 0x4ad   :  { %1908 = vmatprep.subr.mxu0 %v2406_v0 }
 0x4ae   :  { %1909 = vmatpush3.msra.mxu0 %v813_v58  ;;  %v708_v58 = vld [vmem:[#allocation13 + $0x90] sm:$0xff] }
 0x4af   :  { %1910 = vmatprep.subr.mxu0 %v2406_v0 }
 0x4b0   :  { %1911 = vmatpush3.msra.mxu0 %v812_v59  ;;  %v1471_v59 = vld [vmem:[%s2851_s10 + $0x1] ss:$0 sm:$0xff] }
 0x4b1   :  { %1912 = vmatprep.subr.mxu0 %v2406_v0 }
 0x4b2   :  { %1913 = vmatpush3.msra.mxu0 %v811_v60  ;;  %v707_v60 = vld [vmem:[#allocation13 + $0x88] sm:$0xff] }
 0x4b3   :  { %1914 = vmatprep.subr.mxu0 %v2406_v0 }
 0x4b4   :  { %1915 = vmatpush3.msra.mxu0 %v810_v61 }
 0x4b5   :  { %1916 = vmatprep.subr.mxu0 %v2406_v0 }
 0x4b6   :  { %1917 = vmatpush3.msra.mxu0 %v809_v62 }
 0x4b7   :  { %1918 = vmatprep.subr.mxu0 %v2406_v0 }
 0x4b8   :  { %1919 = vmatpush3.msra.mxu0 %v808_v63  ;;  %v706_v63 = vld [vmem:[#allocation13 + $0x80] sm:$0xff] }
 0x4b9   :  { %1920 = vmatprep.subr.mxu0 %v2406_v0 }
 0x4ba   :  { %1921 = vmatpush3.msra.mxu0 %v807_v1 }
 0x4bb   :  { %1922 = vmatprep.subr.mxu0 %v2406_v0 }
 0x4bc   :  { %1923 = vmatpush3.msra.mxu0 %v806_v2 }
 0x4bd   :  { %1924 = vmatprep.subr.mxu0 %v2406_v0 }
 0x4be   :  { %1925 = vmatpush3.msra.mxu0 %v805_v3  ;;  %v914_v3 = vld [vmem:[#allocation13 + $0x178] sm:$0xff] }
 0x4bf   :  { %1926 = vmatprep.subr.mxu0 %v2406_v0 }
 0x4c0   :  { %1927 = vmatpush3.msra.mxu0 %v804_v4  ;;  %v913_v4 = vld [vmem:[#allocation13 + $0x170] sm:$0xff] }
 0x4c1   :  { %1928 = vmatprep.subr.mxu0 %v2406_v0 }
 0x4c2   :  { %1929 = vmatpush3.msra.mxu0 %v803_v5  ;;  %v912_v5 = vld [vmem:[#allocation13 + $0x168] sm:$0xff] }
 0x4c3   :  { %1931 = vmatmul.mubr.f32.vlgmr.msra.gmra.mxu0 %v2630_v22  ;;  %1968 = vmatprep.subr.mxu0 %v2406_v0 }
 0x4c4   :  { %1969 = vmatpush3.msra.mxu0 %v1011_v6  ;;  %2000 = vmatprep.mubr.msk.f32.mxu0 %vm2407_vm0, %v2406_v0  ;;  %v911_v6 = vld [vmem:[#allocation13 + $0x160] sm:$0xff] }
 0x4c5   :  { %1970 = vmatprep.subr.mxu0 %v2406_v0 }
 0x4c6   :  { %1971 = vmatpush3.msra.mxu0 %v1010_v7  ;;  %v910_v7 = vld [vmem:[#allocation13 + $0x158] sm:$0xff] }
 0x4c7   :  { %1972 = vmatprep.subr.mxu0 %v2406_v0 }
 0x4c8   :  { %1973 = vmatpush3.msra.mxu0 %v1009_v9  ;;  %v908_v9 = vld [vmem:[#allocation13 + $0x148] sm:$0xff] }
 0x4c9   :  { %1974 = vmatprep.subr.mxu0 %v2406_v0 }
 0x4ca   :  { %1975 = vmatpush3.msra.mxu0 %v1008_v11  ;;  %v906_v11 = vld [vmem:[#allocation13 + $0x138] sm:$0xff] }
 0x4cb   :  { %1976 = vmatprep.subr.mxu0 %v2406_v0 }
 0x4cc   :  { %1977 = vmatpush3.msra.mxu0 %v1007_v12  ;;  %v905_v12 = vld [vmem:[#allocation13 + $0x130] sm:$0xff] }
 0x4cd   :  { %1978 = vmatprep.subr.mxu0 %v2406_v0 }
 0x4ce   :  { %1979 = vmatpush3.msra.mxu0 %v1006_v13  ;;  %v904_v13 = vld [vmem:[#allocation13 + $0x128] sm:$0xff] }
 0x4cf   :  { %1980 = vmatprep.subr.mxu0 %v2406_v0 }
 0x4d0   :  { %1981 = vmatpush3.msra.mxu0 %v1005_v14  ;;  %v903_v14 = vld [vmem:[#allocation13 + $0x120] sm:$0xff] }
 0x4d1   :  { %1982 = vmatprep.subr.mxu0 %v2406_v0 }
 0x4d2   :  { %1983 = vmatpush3.msra.mxu0 %v1004_v15  ;;  %v902_v15 = vld [vmem:[#allocation13 + $0x118] sm:$0xff] }
 0x4d3   :  { %1984 = vmatprep.subr.mxu0 %v2406_v0 }
 0x4d4   :  { %1985 = vmatpush3.msra.mxu0 %v1003_v16  ;;  %v901_v16 = vld [vmem:[#allocation13 + $0x110] sm:$0xff] }
 0x4d5   :  { %1986 = vmatprep.subr.mxu0 %v2406_v0 }
 0x4d6   :  { %1987 = vmatpush3.msra.mxu0 %v1002_v17  ;;  %v1475_v17 = vld [vmem:[%s2851_s10 + $0x2] ss:$0 sm:$0xff] }
 0x4d7   :  { %1988 = vmatprep.subr.mxu0 %v2406_v0 }
 0x4d8   :  { %1989 = vmatpush3.msra.mxu0 %v1001_v18  ;;  %v900_v18 = vld [vmem:[#allocation13 + $0x108] sm:$0xff] }
 0x4d9   :  { %1990 = vmatprep.subr.mxu0 %v2406_v0 }
 0x4da   :  { %1991 = vmatpush3.msra.mxu0 %v1000_v19 }
 0x4db   :  { %1992 = vmatprep.subr.mxu0 %v2406_v0 }
 0x4dc   :  { %1993 = vmatpush3.msra.mxu0 %v999_v20 }
 0x4dd   :  { %1994 = vmatprep.subr.mxu0 %v2406_v0 }
 0x4de   :  { %1995 = vmatpush3.msra.mxu0 %v998_v21  ;;  %v899_v21 = vld [vmem:[#allocation13 + $0x100] sm:$0xff] }
 0x4df   :  { %1996 = vmatprep.subr.mxu0 %v2406_v0 }
 0x4e0   :  { %1997 = vmatpush3.msra.mxu0 %v997_v23 }
 0x4e1   :  { %1998 = vmatprep.subr.mxu0 %v2406_v0 }
 0x4e2   :  { %1999 = vmatpush3.msra.mxu0 %v996_v24 }
 0x4e3   :  { %2001 = vmatmul.mubr.f32.vlgmr.msra.gmra.mxu0 %v2630_v22  ;;  %2038 = vmatprep.subr.mxu0 %v2406_v0 }
 0x4e4   :  { %2039 = vmatpush3.msra.mxu0 %v1203_v25  ;;  %2070 = vmatprep.mubr.msk.f32.mxu0 %vm2407_vm0, %v2406_v0  ;;  %v1107_v25 = vld [vmem:[#allocation13 + $0x1f8] sm:$0xff] }
 0x4e5   :  { %2040 = vmatprep.subr.mxu0 %v2406_v0 }
 0x4e6   :  { %2041 = vmatpush3.msra.mxu0 %v1202_v26  ;;  %v1106_v26 = vld [vmem:[#allocation13 + $0x1f0] sm:$0xff] }
 0x4e7   :  { %2042 = vmatprep.subr.mxu0 %v2406_v0 }
 0x4e8   :  { %2043 = vmatpush3.msra.mxu0 %v1201_v27  ;;  %v1105_v27 = vld [vmem:[#allocation13 + $0x1e8] sm:$0xff] }
 0x4e9   :  { %2044 = vmatprep.subr.mxu0 %v2406_v0 }
 0x4ea   :  { %2045 = vmatpush3.msra.mxu0 %v1200_v28  ;;  %v1104_v28 = vld [vmem:[#allocation13 + $0x1e0] sm:$0xff] }
 0x4eb   :  { %2046 = vmatprep.subr.mxu0 %v2406_v0 }
 0x4ec   :  { %2047 = vmatpush3.msra.mxu0 %v1199_v29  ;;  %v1103_v29 = vld [vmem:[#allocation13 + $0x1d8] sm:$0xff] }
 0x4ed   :  { %2048 = vmatprep.subr.mxu0 %v2406_v0 }
 0x4ee   :  { %2049 = vmatpush3.msra.mxu0 %v1198_v30  ;;  %v1102_v30 = vld [vmem:[#allocation13 + $0x1d0] sm:$0xff] }
 0x4ef   :  { %2050 = vmatprep.subr.mxu0 %v2406_v0 }
 0x4f0   :  { %2051 = vmatpush3.msra.mxu0 %v1197_v31  ;;  %v1101_v31 = vld [vmem:[#allocation13 + $0x1c8] sm:$0xff] }
 0x4f1   :  { %2052 = vmatprep.subr.mxu0 %v2406_v0 }
 0x4f2   :  { %2053 = vmatpush3.msra.mxu0 %v1196_v32  ;;  %v1100_v32 = vld [vmem:[#allocation13 + $0x1c0] sm:$0xff] }
 0x4f3   :  { %2054 = vmatprep.subr.mxu0 %v2406_v0 }
 0x4f4   :  { %2055 = vmatpush3.msra.mxu0 %v1195_v33  ;;  %v1099_v33 = vld [vmem:[#allocation13 + $0x1b8] sm:$0xff] }
 0x4f5   :  { %2056 = vmatprep.subr.mxu0 %v2406_v0 }
 0x4f6   :  { %2057 = vmatpush3.msra.mxu0 %v1194_v34  ;;  %v1098_v34 = vld [vmem:[#allocation13 + $0x1b0] sm:$0xff] }
 0x4f7   :  { %2058 = vmatprep.subr.mxu0 %v2406_v0 }
 0x4f8   :  { %2059 = vmatpush3.msra.mxu0 %v1193_v35  ;;  %v1097_v35 = vld [vmem:[#allocation13 + $0x1a8] sm:$0xff] }
 0x4f9   :  { %2060 = vmatprep.subr.mxu0 %v2406_v0 }
 0x4fa   :  { %2061 = vmatpush3.msra.mxu0 %v1192_v36  ;;  %v1096_v36 = vld [vmem:[#allocation13 + $0x1a0] sm:$0xff] }
 0x4fb   :  { %2062 = vmatprep.subr.mxu0 %v2406_v0 }
 0x4fc   :  { %2063 = vmatpush3.msra.mxu0 %v1191_v37  ;;  %v1095_v37 = vld [vmem:[#allocation13 + $0x198] sm:$0xff] }
 0x4fd   :  { %2064 = vmatprep.subr.mxu0 %v2406_v0 }
 0x4fe   :  { %2065 = vmatpush3.msra.mxu0 %v1190_v38  ;;  %v1094_v38 = vld [vmem:[#allocation13 + $0x190] sm:$0xff] }
 0x4ff   :  { %2066 = vmatprep.subr.mxu0 %v2406_v0 }
 0x500   :  { %2067 = vmatpush3.msra.mxu0 %v1189_v39  ;;  %v1479_v39 = vld [vmem:[%s2851_s10 + $0x3] ss:$0 sm:$0xff] }
 0x501   :  { %2068 = vmatprep.subr.mxu0 %v2406_v0 }
 0x502   :  { %2069 = vmatpush3.msra.mxu0 %v1188_v40  ;;  %v1093_v40 = vld [vmem:[#allocation13 + $0x188] sm:$0xff] }
 0x503   :  { %2071 = vmatmul.mubr.f32.vlgmr.msra.gmra.mxu0 %v2630_v22  ;;  %v718_v22 = vld [vmem:[#allocation13 + $0xe0] sm:$0xff] }
 0x543   :  { %v510_v42 = vpop.f32.mrf.mxu0 }
 0x544   :  { %v511_v43 = vadd.f32 %v1468_v41, %v510_v42 }
 0x545   :  { %v1792_v44 = vpop.f32.mrf.mxu0 }
 0x546   :  { %v514_v45 = vmax.f32 %v511_v43, 0.0  ;;  %v1092_v43 = vld [vmem:[#allocation13 + $0x180] sm:$0xff] }
 0x548   :  { %1826 = vmatmul.mubr.f32.vlgmr.msra.gmra.mxu1 %v514_v45 }
 0x549   :  { %1864 = vmatpush3.msra.mxu1 %v721_v46  ;;  %1895 = vmatprep.mubr.msk.f32.mxu1 %vm2407_vm0, %v2406_v0  ;;  %v1297_v46 = vld [vmem:[#allocation16 + $0x78] sm:$0xff] }
 0x54a   :  { %1865 = vmatprep.subr.mxu1 %v2406_v0 }
 0x54b   :  { %1866 = vmatpush3.msra.mxu1 %v720_v47  ;;  %v1296_v47 = vld [vmem:[#allocation16 + $0x70] sm:$0xff] }
 0x54c   :  { %1867 = vmatprep.subr.mxu1 %v2406_v0 }
 0x54d   :  { %1868 = vmatpush3.msra.mxu1 %v719_v48  ;;  %v1295_v48 = vld [vmem:[#allocation16 + $0x68] sm:$0xff] }
 0x54e   :  { %1869 = vmatprep.subr.mxu1 %v2406_v0 }
 0x54f   :  { %1870 = vmatpush3.msra.mxu1 %v718_v22  ;;  %v1294_v22 = vld [vmem:[#allocation16 + $0x60] sm:$0xff] }
 0x550   :  { %1871 = vmatprep.subr.mxu1 %v2406_v0 }
 0x551   :  { %1872 = vmatpush3.msra.mxu1 %v717_v49  ;;  %v1293_v49 = vld [vmem:[#allocation16 + $0x58] sm:$0xff] }
 0x552   :  { %1873 = vmatprep.subr.mxu1 %v2406_v0 }
 0x553   :  { %1874 = vmatpush3.msra.mxu1 %v716_v50  ;;  %v1292_v50 = vld [vmem:[#allocation16 + $0x50] sm:$0xff] }
 0x554   :  { %1875 = vmatprep.subr.mxu1 %v2406_v0 }
 0x555   :  { %1876 = vmatpush3.msra.mxu1 %v715_v51  ;;  %v1291_v51 = vld [vmem:[#allocation16 + $0x48] sm:$0xff] }
 0x556   :  { %1877 = vmatprep.subr.mxu1 %v2406_v0 }
 0x557   :  { %1878 = vmatpush3.msra.mxu1 %v714_v52  ;;  %v1290_v52 = vld [vmem:[#allocation16 + $0x40] sm:$0xff] }
 0x558   :  { %1879 = vmatprep.subr.mxu1 %v2406_v0 }
 0x559   :  { %1880 = vmatpush3.msra.mxu1 %v713_v53  ;;  %v1289_v53 = vld [vmem:[#allocation16 + $0x38] sm:$0xff] }
 0x55a   :  { %1881 = vmatprep.subr.mxu1 %v2406_v0 }
 0x55b   :  { %1882 = vmatpush3.msra.mxu1 %v712_v54  ;;  %v1288_v54 = vld [vmem:[#allocation16 + $0x30] sm:$0xff] }
 0x55c   :  { %1883 = vmatprep.subr.mxu1 %v2406_v0 }
 0x55d   :  { %1884 = vmatpush3.msra.mxu1 %v711_v55  ;;  %v1287_v55 = vld [vmem:[#allocation16 + $0x28] sm:$0xff] }
 0x55e   :  { %1885 = vmatprep.subr.mxu1 %v2406_v0 }
 0x55f   :  { %1886 = vmatpush3.msra.mxu1 %v710_v56  ;;  %v1286_v56 = vld [vmem:[#allocation16 + $0x20] sm:$0xff] }
 0x560   :  { %1887 = vmatprep.subr.mxu1 %v2406_v0 }
 0x561   :  { %1888 = vmatpush3.msra.mxu1 %v709_v57  ;;  %v1285_v57 = vld [vmem:[#allocation16 + $0x18] sm:$0xff] }
 0x562   :  { %1889 = vmatprep.subr.mxu1 %v2406_v0 }
 0x563   :  { %v700_v61 = vpop.f32.mrf.mxu0  ;;  %1890 = vmatpush3.msra.mxu1 %v708_v58  ;;  %v1284_v58 = vld [vmem:[#allocation16 + $0x10] sm:$0xff] }
 0x564   :  { %v701_v62 = vadd.f32 %v1471_v59, %v700_v61  ;;  %1891 = vmatprep.subr.mxu1 %v2406_v0  ;;  %v1482_v59 = vld [vmem:[%s2855_s14] ss:$0 sm:$0xff] }
 0x565   :  { %v1862_v1 = vpop.f32.mrf.mxu0  ;;  %1892 = vmatpush3.msra.mxu1 %v707_v60  ;;  %v1283_v60 = vld [vmem:[#allocation16 + $0x8] sm:$0xff] }
 0x566   :  { %v704_v2 = vmax.f32 %v701_v62, 0.0  ;;  %1893 = vmatprep.subr.mxu1 %v2406_v0 }
 0x567   :  { %1894 = vmatpush3.msra.mxu1 %v706_v63  ;;  %v1282_v63 = vld [vmem:[#allocation16] sm:$0xff] }
 0x568   :  { %1896 = vmatmul.mubr.f32.vlgmr.msra.gmra.mxu1 %v704_v2  ;;  %1933 = vmatprep.subr.mxu1 %v2406_v0 }
 0x569   :  { %1934 = vmatpush3.msra.mxu1 %v914_v3  ;;  %1965 = vmatprep.mubr.msk.f32.mxu1 %vm2407_vm0, %v2406_v0  ;;  %v1469_v3 = vld [vmem:[%s2853_s12] ss:$0 sm:$0xff] }
 0x56a   :  { %1935 = vmatprep.subr.mxu1 %v2406_v0 }
 0x56b   :  { %1936 = vmatpush3.msra.mxu1 %v913_v4 }
 0x56c   :  { %1937 = vmatprep.subr.mxu1 %v2406_v0 }
 0x56d   :  { %1938 = vmatpush3.msra.mxu1 %v912_v5 }
 0x56e   :  { %1939 = vmatprep.subr.mxu1 %v2406_v0 }
 0x56f   :  { %1940 = vmatpush3.msra.mxu1 %v911_v6 }
 0x570   :  { %1941 = vmatprep.subr.mxu1 %v2406_v0 }
 0x571   :  { %1942 = vmatpush3.msra.mxu1 %v910_v7  ;;  %v1473_v7 = vld [vmem:[%s2853_s12 + $0x1] ss:$0 sm:$0xff] }
 0x572   :  { %1943 = vmatprep.subr.mxu1 %v2406_v0 }
 0x573   :  { %1944 = vmatpush3.msra.mxu1 %v909_v8 }
 0x574   :  { %1945 = vmatprep.subr.mxu1 %v2406_v0 }
 0x575   :  { %1946 = vmatpush3.msra.mxu1 %v908_v9 }
 0x576   :  { %1947 = vmatprep.subr.mxu1 %v2406_v0 }
 0x577   :  { %1948 = vmatpush3.msra.mxu1 %v907_v10 }
 0x578   :  { %1949 = vmatprep.subr.mxu1 %v2406_v0 }
 0x579   :  { %1950 = vmatpush3.msra.mxu1 %v906_v11 }
 0x57a   :  { %1951 = vmatprep.subr.mxu1 %v2406_v0 }
 0x57b   :  { %1952 = vmatpush3.msra.mxu1 %v905_v12 }
 0x57c   :  { %1953 = vmatprep.subr.mxu1 %v2406_v0 }
 0x57d   :  { %1954 = vmatpush3.msra.mxu1 %v904_v13 }
 0x57e   :  { %1955 = vmatprep.subr.mxu1 %v2406_v0 }
 0x57f   :  { %1956 = vmatpush3.msra.mxu1 %v903_v14  ;;  %v1481_v14 = vld [vmem:[%s2853_s12 + $0x3] ss:$0 sm:$0xff] }
 0x580   :  { %1957 = vmatprep.subr.mxu1 %v2406_v0 }
 0x581   :  { %1958 = vmatpush3.msra.mxu1 %v902_v15 }
 0x582   :  { %1959 = vmatprep.subr.mxu1 %v2406_v0 }
 0x583   :  { %v893_v19 = vpop.f32.mrf.mxu0  ;;  %1960 = vmatpush3.msra.mxu1 %v901_v16 }
 0x584   :  { %v894_v20 = vadd.f32 %v1475_v17, %v893_v19  ;;  %1961 = vmatprep.subr.mxu1 %v2406_v0 }
 0x585   :  { %v1932_v23 = vpop.f32.mrf.mxu0  ;;  %1962 = vmatpush3.msra.mxu1 %v900_v18  ;;  %v1375_v18 = vlaneseq }
 0x586   :  { %v897_v24 = vmax.f32 %v894_v20, 0.0  ;;  %1963 = vmatprep.subr.mxu1 %v2406_v0  ;;  %v1483_v20 = vld [vmem:[%s2857_s16] ss:$0 sm:$0xff] }
 0x587   :  { %1964 = vmatpush3.msra.mxu1 %v899_v21  ;;  %v1376_v19 = vand.u32 127, %v1375_v18 }
 0x588   :  { %1966 = vmatmul.mubr.f32.vlgmr.msra.gmra.mxu1 %v897_v24  ;;  %2003 = vmatprep.subr.mxu1 %v2406_v0 }
 0x589   :  { %2004 = vmatpush3.msra.mxu1 %v1107_v25  ;;  %2035 = vmatprep.mubr.msk.f32.mxu1 %vm2407_vm0, %v2406_v0  ;;  %vm1377_vm1 = vcmp.lt.s32.totalorder %v1376_v19, 4 }
 0x58a   :  { %2005 = vmatprep.subr.mxu1 %v2406_v0 }
 0x58b   :  { %2006 = vmatpush3.msra.mxu1 %v1106_v26 }
 0x58c   :  { %2007 = vmatprep.subr.mxu1 %v2406_v0 }
 0x58d   :  { %2008 = vmatpush3.msra.mxu1 %v1105_v27 }
 0x58e   :  { %2009 = vmatprep.subr.mxu1 %v2406_v0 }
 0x58f   :  { %2010 = vmatpush3.msra.mxu1 %v1104_v28 }
 0x590   :  { %2011 = vmatprep.subr.mxu1 %v2406_v0 }
 0x591   :  { %2012 = vmatpush3.msra.mxu1 %v1103_v29 }
 0x592   :  { %2013 = vmatprep.subr.mxu1 %v2406_v0 }
 0x593   :  { %2014 = vmatpush3.msra.mxu1 %v1102_v30  ;;  %v2408_v30 = vmov 1  }
 0x594   :  { %2015 = vmatprep.subr.mxu1 %v2406_v0  ;;  %2129 = vset.pattern.permute.xlu1 %v2408_v30 }
 0x595   :  { %2016 = vmatpush3.msra.mxu1 %v1101_v31  ;;  %v2409_v31 = vmov 0  }
 0x596   :  { %2017 = vmatprep.subr.mxu1 %v2406_v0  ;;  %2128 = vset.pattern.permute.xlu0 %v2409_v31 }
 0x597   :  { %2018 = vmatpush3.msra.mxu1 %v1100_v32 }
 0x598   :  { %2019 = vmatprep.subr.mxu1 %v2406_v0 }
 0x599   :  { %2020 = vmatpush3.msra.mxu1 %v1099_v33 }
 0x59a   :  { %2021 = vmatprep.subr.mxu1 %v2406_v0 }
 0x59b   :  { %2022 = vmatpush3.msra.mxu1 %v1098_v34 }
 0x59c   :  { %2023 = vmatprep.subr.mxu1 %v2406_v0 }
 0x59d   :  { %2024 = vmatpush3.msra.mxu1 %v1097_v35  ;;  %v2410_v35 = vmov 2  }
 0x59e   :  { %2025 = vmatprep.subr.mxu1 %v2406_v0 }
 0x59f   :  { %2026 = vmatpush3.msra.mxu1 %v1096_v36  ;;  %v2411_v36 = vmov 3  }
 0x5a0   :  { %2027 = vmatprep.subr.mxu1 %v2406_v0 }
 0x5a1   :  { %2028 = vmatpush3.msra.mxu1 %v1095_v37 }
 0x5a2   :  { %2029 = vmatprep.subr.mxu1 %v2406_v0 }
 0x5a3   :  { %v1086_v41 = vpop.f32.mrf.mxu0  ;;  %2030 = vmatpush3.msra.mxu1 %v1094_v38 }
 0x5a4   :  { %v1087_v42 = vadd.f32 %v1479_v39, %v1086_v41  ;;  %2031 = vmatprep.subr.mxu1 %v2406_v0 }
 0x5a5   :  { %v2002_v44 = vpop.f32.mrf.mxu0  ;;  %2032 = vmatpush3.msra.mxu1 %v1093_v40 }
 0x5a6   :  { %v1090_v45 = vmax.f32 %v1087_v42, 0.0  ;;  %2033 = vmatprep.subr.mxu1 %v2406_v0 }
 0x5a7   :  { %2034 = vmatpush3.msra.mxu1 %v1092_v43 }
 0x5a8   :  { %2036 = vmatmul.mubr.f32.vlgmr.msra.gmra.mxu1 %v1090_v45  ;;  %2073 = vmatprep.subr.mxu1 %v2406_v0 }
 0x5a9   :  { %2074 = vmatpush3.msra.mxu1 %v1297_v46  ;;  %2105 = vmatprep.mubr.msk.f32.mxu1 %vm2407_vm0, %v2406_v0 }
 0x5aa   :  { %2075 = vmatprep.subr.mxu1 %v2406_v0 }
 0x5ab   :  { %2076 = vmatpush3.msra.mxu1 %v1296_v47 }
 0x5ac   :  { %2077 = vmatprep.subr.mxu1 %v2406_v0 }
 0x5ad   :  { %2078 = vmatpush3.msra.mxu1 %v1295_v48 }
 0x5ae   :  { %2079 = vmatprep.subr.mxu1 %v2406_v0 }
 0x5af   :  { %2080 = vmatpush3.msra.mxu1 %v1294_v22 }
 0x5b0   :  { %2081 = vmatprep.subr.mxu1 %v2406_v0 }
 0x5b1   :  { %2082 = vmatpush3.msra.mxu1 %v1293_v49 }
 0x5b2   :  { %2083 = vmatprep.subr.mxu1 %v2406_v0 }
 0x5b3   :  { %2084 = vmatpush3.msra.mxu1 %v1292_v50 }
 0x5b4   :  { %2085 = vmatprep.subr.mxu1 %v2406_v0 }
 0x5b5   :  { %2086 = vmatpush3.msra.mxu1 %v1291_v51 }
 0x5b6   :  { %2087 = vmatprep.subr.mxu1 %v2406_v0 }
 0x5b7   :  { %2088 = vmatpush3.msra.mxu1 %v1290_v52 }
 0x5b8   :  { %2089 = vmatprep.subr.mxu1 %v2406_v0 }
 0x5b9   :  { %2090 = vmatpush3.msra.mxu1 %v1289_v53 }
 0x5ba   :  { %2091 = vmatprep.subr.mxu1 %v2406_v0 }
 0x5bb   :  { %2092 = vmatpush3.msra.mxu1 %v1288_v54 }
 0x5bc   :  { %2093 = vmatprep.subr.mxu1 %v2406_v0 }
 0x5bd   :  { %2094 = vmatpush3.msra.mxu1 %v1287_v55 }
 0x5be   :  { %2095 = vmatprep.subr.mxu1 %v2406_v0 }
 0x5bf   :  { %2096 = vmatpush3.msra.mxu1 %v1286_v56 }
 0x5c0   :  { %2097 = vmatprep.subr.mxu1 %v2406_v0 }
 0x5c1   :  { %2098 = vmatpush3.msra.mxu1 %v1285_v57 }
 0x5c2   :  { %2099 = vmatprep.subr.mxu1 %v2406_v0 }
 0x5c3   :  { %v1277_v61 = vpop.f32.mrf.mxu0  ;;  %2100 = vmatpush3.msra.mxu1 %v1284_v58 }
 0x5c4   :  { %v1278_v62 = vadd.f32 %v1482_v59, %v1277_v61  ;;  %2101 = vmatprep.subr.mxu1 %v2406_v0 }
 0x5c5   :  { %v2072_v1 = vpop.f32.mrf.mxu0  ;;  %2102 = vmatpush3.msra.mxu1 %v1283_v60 }
 0x5c6   :  { %v1281_v2 = vmax.f32 %v1278_v62, 0.0  ;;  %2103 = vmatprep.subr.mxu1 %v2406_v0  ;;  %v1477_v0 = vld [vmem:[%s2853_s12 + $0x2] ss:$0 sm:$0xff]  ;;  %s2412_s12 = smov [#allocation17]  }
 0x5c7   :  { %2104 = vmatpush3.msra.mxu1 %v1282_v63  ;;  %s1419_s16 = sshll.u32 %s2412_s12, 4  ;;  %s1420_s16 = int_to_ptr.vmem [resolvable:$true] %s1419_s16 }
 0x5c8   :  { %2106 = vmatmul.mubr.f32.vlgmr.msra.gmra.mxu1 %v1281_v2  ;;  %s2321_s6 = scalar_lea.vmem %s1420_s16, 512  ;;  %p2326_p4 = scmp.lt.s32.totalorder %s1420_s16, %s1420_s16 }
 0x5c9   :  { %p2322_p3 = scmp.ne.s32.totalorder %s1420_s16, %s2321_s6  ;;  %p2327_p5 = scmp.lt.s32.totalorder %s2321_s6, %s2321_s6 }
 0x5cb   :  { %p2328_p6 = por %p2327_p5, %p2326_p4 }
 0x5cd   :  { %p2329_p7 = pnand %p2328_p6, %p2322_p3 }
 0x608   :  { %v604_v4 = vpop.f32.mrf.mxu1 }
 0x609   :  { %v2813_v5 = vadd.f32 %v1469_v3, %v604_v4 }
 0x60a   :  { %v1827_v6 = vpop.f32.mrf.mxu1 }
 0x60b   :  { %608 = vst [vmem:[#allocation17] sm:$0xff] %v2813_v5 }
 0x628   :  { %v796_v8 = vpop.f32.mrf.mxu1 }
 0x629   :  { %v797_v9 = vadd.f32 %v1473_v7, %v796_v8 }
 0x62a   :  { %v1897_v10 = vpop.f32.mrf.mxu1 }
 0x62b   :  { %801 = vst [vmem:[#allocation17 + $0x8] sm:$0xff] %v797_v9 }
 0x648   :  { %v989_v11 = vpop.f32.mrf.mxu1 }
 0x649   :  { %v990_v12 = vadd.f32 %v1477_v0, %v989_v11 }
 0x64a   :  { %v1967_v13 = vpop.f32.mrf.mxu1 }
 0x64b   :  { %994 = vst [vmem:[#allocation17 + $0x10] sm:$0xff] %v990_v12 }
 0x668   :  { %v1182_v15 = vpop.f32.mrf.mxu1 }
 0x669   :  { %v1183_v16 = vadd.f32 %v1481_v14, %v1182_v15 }
 0x66a   :  { %v2037_v17 = vpop.f32.mrf.mxu1 }
 0x66b   :  { %1187 = vst [vmem:[#allocation17 + $0x18] sm:$0xff] %v1183_v16 }
 0x688   :  { %v1371_v21 = vpop.f32.mrf.mxu1 }
 0x689   :  { %v1372_v23 = vadd.f32 %v1483_v20, %v1371_v21 }
 0x68a   :  { %v2107_v24 = vpop.f32.mrf.mxu1 }
 0x68b   :  { %v1378_v25 = vsel %vm1377_vm1, %v1372_v23, -1e+30 }
 0x68c   :  { %1379 = vmax.xlane.f32.xlu0 %v1378_v25 }
 0x715   :  { %v1380_v26 = vpop.xlane.xlu0 %1379 }
 0x716   :  { %v1381_v27 = vsub.f32 %v1378_v25, %v1380_v26 }
 0x718   :  { %v1382_v28 = vmul.f32 1.442695, %v1381_v27 }
 0x71a   :  { %2137 = vpow2.f32 %v1382_v28 }
 0x727   :  { %v2138_v29 = vpop.eup %2137 }
 0x728   :  { %1384 = vadd.xlane.f32.xlu1 %v2138_v29 }
 0x7b1   :  { %v1385_v32 = vpop.xlane.xlu1 %1384 }
 0x7b2   :  { %2139 = vrcp.f32 %v1385_v32 }
 0x7bf   :  { %v2140_v33 = vpop.eup %2139 }
 0x7c0   :  { %v1387_v34 = vmul.f32 %v2140_v33, %v2138_v29 }
 0x7c2   :  { %1396 = vperm.xlu1 %2129, %v1387_v34   ;;  %1388 = vst [vmem:[#allocation20] sm:$0xff] %v1387_v34  ;;  %1391 = vperm.xlu0 %2128, %v1387_v34  }
 0x7c6   :  { %2130 = vset.pattern.permute.xlu1 %v2410_v35  ;;  %2132 = vset.pattern.permute.xlu0 %v2411_v36 }
 0x7c7   :  { %1402 = vperm.xlu1 %2130, %v1387_v34  }
 0x7cb   :  { %2131 = vset.pattern.permute.xlu1 %v2411_v36 }
 0x7cc   :  { %1408 = vperm.xlu1 %2131, %v1387_v34  }
 0x7cd   :  { %2332 = shalt.err (!%p2329_p7)
}
 0x7ce   :  { %1425 = dma.vmem_to_hbm [thread:$0]  %s1420_s16, 512, %s2858_s17, [#allocation4], %s2396_s21, %s2396_s21, %s2397_s1  }
 0x7cf   :  { %s2413_s4 = smov [#allocation18]   ;;  %s2414_s8 = smov [#allocation20]  }
 0x7d0   :  { %s1432_s7 = sshll.u32 %s2413_s4, 4  ;;  %s1442_s27 = sshll.u32 %s2414_s8, 4  ;;  %s1433_s7 = int_to_ptr.vmem [resolvable:$true] %s1432_s7  ;;  %s1443_s27 = int_to_ptr.vmem [resolvable:$true] %s1442_s27 }
 0x7d1   :  { %s2341_s17 = scalar_lea.vmem %s1433_s7, 128  ;;  %p2346_p9 = scmp.lt.s32.totalorder %s1433_s7, %s1433_s7 }
 0x7d2   :  { %p2342_p8 = scmp.ne.s32.totalorder %s1433_s7, %s2341_s17  ;;  %p2347_p10 = scmp.lt.s32.totalorder %s2341_s17, %s2341_s17 }
 0x7d4   :  { %p2348_p11 = por %p2347_p10, %p2346_p9 }
 0x7d6   :  { %p2349_p12 = pnand %p2348_p11, %p2342_p8 }
 0x83d   :  { %v1397_v37 = vpop.permute.xlu1 %1396  ;;  %v1392_v38 = vpop.permute.xlu0 %1391 }
 0x83e   :  { %v1399_v39 = vmul.f32 %v1397_v37, %v797_v9  ;;  %v1394_v40 = vmul.f32 %v1392_v38, %v2813_v5 }
 0x840   :  { %v1400_v43 = vadd.f32 %v1399_v39, %v1394_v40 }
 0x842   :  { %v1403_v41 = vpop.permute.xlu1 %1402 }
 0x843   :  { %v1405_v42 = vmul.f32 %v1403_v41, %v990_v12 }
 0x845   :  { %v1406_v45 = vadd.f32 %v1405_v42, %v1400_v43 }
 0x847   :  { %v1409_v44 = vpop.permute.xlu1 %1408 }
 0x848   :  { %v1411_v46 = vmul.f32 %v1409_v44, %v1183_v16 }
 0x84a   :  { %v1412_v47 = vadd.f32 %v1411_v46, %v1406_v45 }
 0x84c   :  { %1413 = vst [vmem:[#allocation18] sm:$0xff] %v1412_v47 }
 0x84d   :  { %2352 = shalt.err (!%p2349_p12)
}
 0x84e   :  { %1435 = dma.vmem_to_hbm [thread:$0]  %s1433_s7, 128, %s2859_s18, [#allocation19]  }
 0x84f   :  { %s2361_s9 = scalar_lea.vmem %s1443_s27, 128  ;;  %p2366_p0 = scmp.lt.s32.totalorder %s1443_s27, %s1443_s27 }
 0x850   :  { %p2362_p13 = scmp.ne.s32.totalorder %s1443_s27, %s2361_s9  ;;  %p2367_p1 = scmp.lt.s32.totalorder %s2361_s9, %s2361_s9 }
 0x852   :  { %p2368_p2 = por %p2367_p1, %p2366_p0 }
 0x854   :  { %p2369_p3 = pnand %p2368_p2, %p2362_p13 }
 0x856   :  { %2372 = shalt.err (!%p2369_p3)
}
 0x857   :  { %1445 = dma.vmem_to_hbm [thread:$0]  %s1443_s27, 128, %s2860_s19, [#allocation19]  }
 0x858   :  { %2391 = dma.done.wait [#allocation4], 512  }
 0x859   :  { %2392 = vsyncadd [#allocation4], 4294966784 }
 0x85a   :  { %2393 = dma.done.wait [#allocation19], 256  }
 0x85b   :  { %2394 = vsyncadd [#allocation19], 4294967040 }
 0x85c   :  { %1455 = vsyncpa [#allocation3], 1 }
 0x85d   :  { %1456 = vsyncpa [#allocation6], 1 }
 0x85e   :  { %1457 = vsyncpa [#allocation9], 1 }
 0x85f   :  { %1458 = vsyncpa [#allocation12], 1 }
 0x860   :  { %1459 = vsyncpa [#allocation15], 1 }
 0x861   :  { %1460 = vsyncpa [#allocation4], 1 }
 0x862   :  { %1461 = vsyncpa [#allocation19], 1 }

</bundles_post_ra>
